<compile_context>
chip_gen: v7x
topology: tpu7x:2x2x1
jax: 0.10.0
libtpu: 0.0.40
codegen_flags: <defaults>
</compile_context>

<pallas_src>
import jax
import jax.numpy as jnp
import numpy as np
from jax.experimental import pallas as pl
from jax.experimental.pallas import tpu as pltpu


# ----------------------------- kernels -----------------------------

def _make_feat_kernel(write_pts):
    """Feature-extractor kernel body; `write_pts` toggles the points_feat output."""

    def feat_kernel(x_ref, w1_ref, b1_ref, w2_ref, b2_ref, w3_ref, b3_ref,
                    *out_refs):
        if write_pts:
            pts_ref, g_ref = out_refs
        else:
            (g_ref,) = out_refs

        n = pl.program_id(2)                                 # tile index within split
        x = x_ref[0]                                         # (TN, 8) f32, ch 3..7 = 0

        # fc1 (+BN folded): K=3 would waste the MXU contraction dim, so use three
        # exact-f32 VPU broadcast multiply-adds (hidden under the pts DMA).
        # TODO(synk): if pts writeback is skipped, an MXU K=8 pass could free VPU slots.
        w1 = w1_ref[...]                                     # (3, 64) f32
        h1 = (x[:, 0:1] * w1[0:1, :]
              + x[:, 1:2] * w1[1:2, :]
              + x[:, 2:3] * w1[2:3, :]
              + b1_ref[...])
        h1 = jnp.maximum(h1, 0.0)                            # (TN, 64)

        # fc2/fc3 (+BN folded) on the MXU: bf16 operands, f32 accumulation.
        h2 = jnp.dot(h1.astype(jnp.bfloat16), w2_ref[...],
                     preferred_element_type=jnp.float32) + b2_ref[...]
        h2 = jnp.maximum(h2, 0.0)                            # (TN, 128)
        h3 = jnp.dot(h2.astype(jnp.bfloat16), w3_ref[...],
                     preferred_element_type=jnp.float32) + b3_ref[...]   # (TN, D)

        if write_pts:
            pts_ref[0] = h3.astype(pts_ref.dtype)            # points_feat tile

        # Running max over point tiles; g block is resident across the inner axis.
        tile_max = jnp.max(h3, axis=0, keepdims=True)        # (1, D)

        @pl.when(n == 0)
        def _():
            g_ref[0, 0] = tile_max

        @pl.when(n > 0)
        def _():
            g_ref[0, 0] = jnp.maximum(g_ref[0, 0], tile_max)

    return feat_kernel


def head_kernel(g_ref, wc1_ref, bc1_ref, wc2_ref, bc2_ref, wc3_ref, bc3_ref,
                out_ref):
    """Batched classifier head: (B, 1024) -> (B, k) log-probs."""
    g = g_ref[...]                                           # (B, D) f32
    c1 = jnp.maximum(
        jnp.dot(g.astype(jnp.bfloat16), wc1_ref[...],
                preferred_element_type=jnp.float32) + bc1_ref[...], 0.0)    # (B, 512)
    c2 = jnp.maximum(
        jnp.dot(c1.astype(jnp.bfloat16), wc2_ref[...],
                preferred_element_type=jnp.float32) + bc2_ref[...], 0.0)    # (B, 256)
    c3 = jnp.dot(c2, wc3_ref[...],
                 preferred_element_type=jnp.float32) + bc3_ref[...]         # (B, k)
    # stable log-softmax over classes
    m = jnp.max(c3, axis=-1, keepdims=True)
    z = c3 - m
    lse = jnp.log(jnp.sum(jnp.exp(z), axis=-1, keepdims=True))
    out_ref[...] = (z - lse).astype(out_ref.dtype)


# ----------------------------- wrapper -----------------------------

def _round_up(v, m):
    return -(-v // m) * m


def pointnet_cls_forward(x, params, pts_dtype=jnp.bfloat16,
                         return_points_feat=True, tile_n=None):
    B, N, C = x.shape
    assert C == 3
    D = params["w3"].shape[1]
    k = params["wc3"].shape[1]

    # --- point-axis tiling ---
    # bf16 (or skipped) pts allows TN up to 2048 within v7x's 64 MiB VMEM;
    # f32 pts caps at 1024. Small N rounds up to a sublane multiple.
    pts_is_wide = return_points_feat and jnp.dtype(pts_dtype).itemsize >= 4
    max_tn = 1024 if pts_is_wide else 2048
    if tile_n is not None:
        TN = int(tile_n)
    elif N <= max_tn:
        TN = _round_up(N, 8)
    else:
        TN = max_tn
        while TN > 256 and ((-N) % TN) * 8 > N:   # keep padding waste <= 12.5%
            TN //= 2
    assert TN % 8 == 0

    n_tiles = -(-N // TN)
    # Split the point range across 2 cores when the batch axis cannot occupy
    # both v7x TensorCores (odd / unit batch). No effect on 1-TC chips.
    n_splits = 2 if (B % 2 == 1 and n_tiles >= 2) else 1
    n_tiles = _round_up(n_tiles, n_splits)
    tiles_per_split = n_tiles // n_splits
    N_pad = n_tiles * TN

    # Pad points: edge-replicate along N (duplicates don't change the max —
    # keep this invariant), then zero-pad channels 3 -> 8 for aligned DMA rows.
    if N_pad != N:
        x = jnp.pad(x, ((0, 0), (0, N_pad - N), (0, 0)), mode="edge")
    x = jnp.pad(x, ((0, 0), (0, 0), (0, 5)))

    # bf16 operands for the big matmuls (f32 accumulation on the MXU); biases
    # and the tiny fc1 weight stay f32.
    w1, b1 = params["w1"], params["b1"]
    w2, b2 = params["w2"].astype(jnp.bfloat16), params["b2"]
    w3, b3 = params["w3"].astype(jnp.bfloat16), params["b3"]

    def const_spec(shape):
        r = len(shape)
        return pl.BlockSpec(shape, lambda b, s, n: (0,) * r)

    in_specs = [
        pl.BlockSpec((1, TN, 8), lambda b, s, n: (b, s * tiles_per_split + n, 0)),
        const_spec(w1.shape), const_spec(b1.shape),
        const_spec(w2.shape), const_spec(b2.shape),
        const_spec(w3.shape), const_spec(b3.shape),
    ]
    g_spec = pl.BlockSpec((1, 1, 1, D), lambda b, s, n: (b, s, 0, 0))
    g_shape = jax.ShapeDtypeStruct((B, n_splits, 1, D), jnp.float32)

    if return_points_feat:
        out_specs = (
            pl.BlockSpec((1, TN, D), lambda b, s, n: (b, s * tiles_per_split + n, 0)),
            g_spec,
        )
        out_shape = (jax.ShapeDtypeStruct((B, N_pad, D), pts_dtype), g_shape)
    else:
        out_specs = g_spec
        out_shape = g_shape

    feat_out = pl.pallas_call(
        _make_feat_kernel(return_points_feat),
        grid=(B, n_splits, tiles_per_split),
        in_specs=in_specs,
        out_specs=out_specs,
        out_shape=out_shape,
        compiler_params=pltpu.CompilerParams(
            dimension_semantics=("parallel", "parallel", "arbitrary"),
            vmem_limit_bytes=48 * 1024 * 1024,
        ),
    )(x, w1, b1, w2, b2, w3, b3)

    if return_points_feat:
        pts, gfeat = feat_out
    else:
        pts, gfeat = None, feat_out

    # Combine per-core partial maxes (no-op reshape when n_splits == 1).
    if n_splits > 1:
        g2d = jnp.max(gfeat.reshape(B, n_splits, D), axis=1)
    else:
        g2d = gfeat.reshape(B, D)

    # Classifier head: one batched (M=B) pallas_call over the global features.
    wc1, bc1 = params["wc1"].astype(jnp.bfloat16), params["bc1"]
    wc2, bc2 = params["wc2"].astype(jnp.bfloat16), params["bc2"]
    wc3, bc3 = params["wc3"], params["bc3"]
    head_args = [g2d, wc1, bc1, wc2, bc2, wc3, bc3]

    def full_spec(shape):
        r = len(shape)
        return pl.BlockSpec(shape, lambda i: (0,) * r)

    log_probs = pl.pallas_call(
        head_kernel,
        grid=(1,),
        in_specs=[full_spec(a.shape) for a in head_args],
        out_specs=full_spec((B, k)),
        out_shape=jax.ShapeDtypeStruct((B, k), jnp.float32),
        compiler_params=pltpu.CompilerParams(vmem_limit_bytes=16 * 1024 * 1024),
    )(*head_args)

    if return_points_feat and N_pad != N:
        pts = pts[:, :N, :]
    return log_probs, pts                                   # (B, k), (B, N, D) | None


# ------------------------- parameter construction -------------------------

def _linear_init(key, fan_in, fan_out):
    kw, kb = jax.random.split(key)
    bound = 1.0 / np.sqrt(fan_in)
    W = jax.random.uniform(kw, (fan_in, fan_out), jnp.float32, -bound, bound)  # torch weight.T
    b = jax.random.uniform(kb, (fan_out,), jnp.float32, -bound, bound)
    return W, b


def _bn_init(key, dim):
    kg, kb, km, kv = jax.random.split(key, 4)
    gamma = jax.random.uniform(kg, (dim,), jnp.float32, 0.5, 1.5)
    beta = jax.random.uniform(kb, (dim,), jnp.float32, -0.1, 0.1)
    mean = jax.random.uniform(km, (dim,), jnp.float32, -0.1, 0.1)
    var = jax.random.uniform(kv, (dim,), jnp.float32, 0.5, 1.5)
    return gamma, beta, mean, var


def _fold_bn(W, b, bn_params, eps=1e-5):
    # Inference-mode BatchNorm1d is an exact per-channel affine:
    #   bn(y) = gamma * (y - mean) / sqrt(var + eps) + beta
    gamma, beta, mean, var = bn_params
    scale = gamma / jnp.sqrt(var + eps)
    W_eff = W * scale[None, :]
    b_eff = (b - mean) * scale + beta
    return W_eff, b_eff.reshape(1, -1)


def init_params(key, d=1024, k=2):
    keys = jax.random.split(key, 12)
    params = {}
    # PointNetfeat: fc1/bn1, fc2/bn2, fc3/bn3
    dims = [(3, 64), (64, 128), (128, d)]
    for i, (fi, fo) in enumerate(dims):
        W, b = _linear_init(keys[2 * i], fi, fo)
        Wf, bf = _fold_bn(W, b, _bn_init(keys[2 * i + 1], fo))
        params[f"w{i + 1}"], params[f"b{i + 1}"] = Wf, bf
    # Classifier: fc1/bn1, fc2/bn2, fc3 (no BN)
    W, b = _linear_init(keys[6], d, 512)
    params["wc1"], params["bc1"] = _fold_bn(W, b, _bn_init(keys[7], 512))
    W, b = _linear_init(keys[8], d=None or 512, fan_out=256) if False else _linear_init(keys[8], 512, 256)
    params["wc2"], params["bc2"] = _fold_bn(W, b, _bn_init(keys[9], 256))
    W, b = _linear_init(keys[10], 256, k)
    params["wc3"], params["bc3"] = W, b.reshape(1, -1)
    return params


# ------------------------- pure-JAX reference -------------------------
# Mirrors the kernel's mixed-precision policy (bf16 matmul operands, f32
# accumulation) so the Pallas implementation can be checked tightly.

def reference_forward(x, params):
    w2 = params["w2"].astype(jnp.bfloat16)
    w3 = params["w3"].astype(jnp.bfloat16)
    wc1 = params["wc1"].astype(jnp.bfloat16)
    wc2 = params["wc2"].astype(jnp.bfloat16)

    h1 = jnp.maximum(x @ params["w1"] + params["b1"], 0.0)
    h2 = jnp.maximum(
        jnp.einsum("bnc,cd->bnd", h1.astype(jnp.bfloat16), w2,
                   preferred_element_type=jnp.float32) + params["b2"], 0.0)
    h3 = jnp.einsum("bnc,cd->bnd", h2.astype(jnp.bfloat16), w3,
                    preferred_element_type=jnp.float32) + params["b3"]       # (B, N, d)
    g = jnp.max(h3, axis=1)                                                  # (B, d)
    c1 = jnp.maximum(
        jnp.dot(g.astype(jnp.bfloat16), wc1,
                preferred_element_type=jnp.float32) + params["bc1"], 0.0)
    c2 = jnp.maximum(
        jnp.dot(c1.astype(jnp.bfloat16), wc2,
                preferred_element_type=jnp.float32) + params["bc2"], 0.0)
    c3 = c2 @ params["wc3"] + params["bc3"]
    return jax.nn.log_softmax(c3, axis=-1), h3


if __name__ == "__main__":
    B, N, d, k = 2, 16, 1024, 2
    key = jax.random.PRNGKey(0)
    kx, kp = jax.random.split(key)
    x = jax.random.normal(kx, (B, N, 3), jnp.float32)
    params = init_params(kp, d=d, k=k)

    fwd = jax.jit(pointnet_cls_forward,
                  static_argnames=("pts_dtype", "return_points_feat", "tile_n"))

    # 1) Default path: bf16 points_feat + log-probs.
    log_probs, points_feat = fwd(x, params)
    jax.block_until_ready((log_probs, points_feat))
    ref_lp, ref_pf = reference_forward(x, params)
    assert log_probs.shape == (B, k) and points_feat.shape == (B, N, d)
    assert points_feat.dtype == jnp.bfloat16
    np.testing.assert_allclose(np.asarray(log_probs), np.asarray(ref_lp),
                               rtol=5e-3, atol=5e-3)
    np.testing.assert_allclose(np.asarray(points_feat.astype(jnp.float32)),
                               np.asarray(ref_pf), rtol=2e-2, atol=2e-2)

    # 2) Classify-only path: pts never materialized.
    lp_only, no_pts = fwd(x, params, return_points_feat=False)
    lp_only = jax.block_until_ready(lp_only)
    assert no_pts is None
    np.testing.assert_allclose(np.asarray(lp_only), np.asarray(ref_lp),
                               rtol=5e-3, atol=5e-3)

    # 3) Odd batch + multi-tile: exercises N padding and the 2-way point-axis
    #    split (two per-core partial maxes combined in the wrapper).
    B2, N2 = 1, 44
    x2 = jax.random.normal(jax.random.PRNGKey(1), (B2, N2, 3), jnp.float32)
    lp2, pf2 = fwd(x2, params, tile_n=16)
    jax.block_until_ready((lp2, pf2))
    ref_lp2, ref_pf2 = reference_forward(x2, params)
    assert lp2.shape == (B2, k) and pf2.shape == (B2, N2, d)
    np.testing.assert_allclose(np.asarray(lp2), np.asarray(ref_lp2),
                               rtol=5e-3, atol=5e-3)
    np.testing.assert_allclose(np.asarray(pf2.astype(jnp.float32)),
                               np.asarray(ref_pf2), rtol=2e-2, atol=2e-2)

    print("KERNEL_OK")
</pallas_src>

<mosaic_0001>
module attributes {stable_mosaic.version = 11 : i64} {
  func.func @feat_kernel(%arg0: i32, %arg1: i32, %arg2: i32, %arg3: memref<1x16x8xf32, #tpu.memory_space<vmem>>, %arg4: memref<3x64xf32, #tpu.memory_space<vmem>>, %arg5: memref<1x64xf32, #tpu.memory_space<vmem>>, %arg6: memref<64x128xbf16, #tpu.memory_space<vmem>>, %arg7: memref<1x128xf32, #tpu.memory_space<vmem>>, %arg8: memref<128x1024xbf16, #tpu.memory_space<vmem>>, %arg9: memref<1x1024xf32, #tpu.memory_space<vmem>>, %arg10: memref<1x16x1024xbf16, #tpu.memory_space<vmem>>, %arg11: memref<1x1x1x1024xf32, #tpu.memory_space<vmem>>) attributes {dimension_semantics = [#tpu.dimension_semantics<parallel>, #tpu.dimension_semantics<parallel>, #tpu.dimension_semantics<arbitrary>], iteration_bounds = array<i64: 2, 1, 1>, scalar_prefetch = 0 : i64, scratch_operands = 0 : i64, tpu.core_type = #tpu.core_type<tc>, window_params = [{transform_indices = @transform_0, window_bounds = array<i64: 1, 16, 8>}, {pipeline_mode = #tpu.pipeline_mode<synchronous>, transform_indices = @transform_1, window_bounds = array<i64: 3, 64>}, {pipeline_mode = #tpu.pipeline_mode<synchronous>, transform_indices = @transform_2, window_bounds = array<i64: 1, 64>}, {pipeline_mode = #tpu.pipeline_mode<synchronous>, transform_indices = @transform_3, window_bounds = array<i64: 64, 128>}, {pipeline_mode = #tpu.pipeline_mode<synchronous>, transform_indices = @transform_4, window_bounds = array<i64: 1, 128>}, {pipeline_mode = #tpu.pipeline_mode<synchronous>, transform_indices = @transform_5, window_bounds = array<i64: 128, 1024>}, {pipeline_mode = #tpu.pipeline_mode<synchronous>, transform_indices = @transform_6, window_bounds = array<i64: 1, 1024>}, {transform_indices = @transform_7, window_bounds = array<i64: 1, 16, 1024>}, {transform_indices = @transform_8, window_bounds = array<i64: 1, 1, 1, 1024>}]} {
    %c0 = arith.constant 0 : index
    %c0_0 = arith.constant 0 : index
    %c0_1 = arith.constant 0 : index
    %0 = vector.load %arg3[%c0, %c0_0, %c0_1] : memref<1x16x8xf32, #tpu.memory_space<vmem>>, vector<1x16x8xf32>
    %1 = vector.shape_cast %0 : vector<1x16x8xf32> to vector<16x8xf32>
    %c0_2 = arith.constant 0 : index
    %c0_3 = arith.constant 0 : index
    %2 = vector.load %arg4[%c0_2, %c0_3] : memref<3x64xf32, #tpu.memory_space<vmem>>, vector<3x64xf32>
    %3 = vector.extract_strided_slice %1 {offsets = [0, 0], sizes = [16, 1], strides = [1, 1]} : vector<16x8xf32> to vector<16x1xf32>
    %4 = vector.extract_strided_slice %2 {offsets = [0, 0], sizes = [1, 64], strides = [1, 1]} : vector<3x64xf32> to vector<1x64xf32>
    %5 = vector.broadcast %3 : vector<16x1xf32> to vector<16x64xf32>
    %6 = vector.broadcast %4 : vector<1x64xf32> to vector<16x64xf32>
    %7 = arith.mulf %5, %6 : vector<16x64xf32>
    %8 = vector.extract_strided_slice %1 {offsets = [0, 1], sizes = [16, 1], strides = [1, 1]} : vector<16x8xf32> to vector<16x1xf32>
    %9 = vector.extract_strided_slice %2 {offsets = [1, 0], sizes = [1, 64], strides = [1, 1]} : vector<3x64xf32> to vector<1x64xf32>
    %10 = vector.broadcast %8 : vector<16x1xf32> to vector<16x64xf32>
    %11 = vector.broadcast %9 : vector<1x64xf32> to vector<16x64xf32>
    %12 = arith.mulf %10, %11 : vector<16x64xf32>
    %13 = arith.addf %7, %12 : vector<16x64xf32>
    %14 = vector.extract_strided_slice %1 {offsets = [0, 2], sizes = [16, 1], strides = [1, 1]} : vector<16x8xf32> to vector<16x1xf32>
    %15 = vector.extract_strided_slice %2 {offsets = [2, 0], sizes = [1, 64], strides = [1, 1]} : vector<3x64xf32> to vector<1x64xf32>
    %16 = vector.broadcast %14 : vector<16x1xf32> to vector<16x64xf32>
    %17 = vector.broadcast %15 : vector<1x64xf32> to vector<16x64xf32>
    %18 = arith.mulf %16, %17 : vector<16x64xf32>
    %19 = arith.addf %13, %18 : vector<16x64xf32>
    %c0_4 = arith.constant 0 : index
    %c0_5 = arith.constant 0 : index
    %20 = vector.load %arg5[%c0_4, %c0_5] : memref<1x64xf32, #tpu.memory_space<vmem>>, vector<1x64xf32>
    %21 = vector.broadcast %20 : vector<1x64xf32> to vector<16x64xf32>
    %22 = arith.addf %19, %21 : vector<16x64xf32>
    %cst = arith.constant 0.000000e+00 : f32
    %23 = vector.broadcast %cst : f32 to vector<16x64xf32>
    %24 = arith.maximumf %22, %23 : vector<16x64xf32>
    %25 = arith.truncf %24 : vector<16x64xf32> to vector<16x64xbf16>
    %c0_6 = arith.constant 0 : index
    %c0_7 = arith.constant 0 : index
    %26 = vector.load %arg6[%c0_6, %c0_7] : memref<64x128xbf16, #tpu.memory_space<vmem>>, vector<64x128xbf16>
    %cst_8 = arith.constant dense<0.000000e+00> : vector<16x128xf32>
    %27 = tpu.matmul %25, %26, %cst_8 {dimension_numbers = #tpu.dot_dimension_numbers<[1], [0], [0], [1], [0, 0, 1, 1], [], []>} : vector<16x64xbf16>, vector<64x128xbf16>, vector<16x128xf32> -> vector<16x128xf32>
    %c0_9 = arith.constant 0 : index
    %c0_10 = arith.constant 0 : index
    %28 = vector.load %arg7[%c0_9, %c0_10] : memref<1x128xf32, #tpu.memory_space<vmem>>, vector<1x128xf32>
    %29 = vector.broadcast %28 : vector<1x128xf32> to vector<16x128xf32>
    %30 = arith.addf %27, %29 : vector<16x128xf32>
    %cst_11 = arith.constant 0.000000e+00 : f32
    %31 = vector.broadcast %cst_11 : f32 to vector<16x128xf32>
    %32 = arith.maximumf %30, %31 : vector<16x128xf32>
    %33 = arith.truncf %32 : vector<16x128xf32> to vector<16x128xbf16>
    %c0_12 = arith.constant 0 : index
    %c0_13 = arith.constant 0 : index
    %34 = vector.load %arg8[%c0_12, %c0_13] : memref<128x1024xbf16, #tpu.memory_space<vmem>>, vector<128x1024xbf16>
    %cst_14 = arith.constant dense<0.000000e+00> : vector<16x1024xf32>
    %35 = tpu.matmul %33, %34, %cst_14 {dimension_numbers = #tpu.dot_dimension_numbers<[1], [0], [0], [1], [0, 0, 1, 1], [], []>} : vector<16x128xbf16>, vector<128x1024xbf16>, vector<16x1024xf32> -> vector<16x1024xf32>
    %c0_15 = arith.constant 0 : index
    %c0_16 = arith.constant 0 : index
    %36 = vector.load %arg9[%c0_15, %c0_16] : memref<1x1024xf32, #tpu.memory_space<vmem>>, vector<1x1024xf32>
    %37 = vector.broadcast %36 : vector<1x1024xf32> to vector<16x1024xf32>
    %38 = arith.addf %35, %37 : vector<16x1024xf32>
    %39 = arith.truncf %38 : vector<16x1024xf32> to vector<16x1024xbf16>
    %c0_17 = arith.constant 0 : index
    %c0_18 = arith.constant 0 : index
    %c0_19 = arith.constant 0 : index
    %40 = vector.load %arg10[%c0_17, %c0_18, %c0_19] : memref<1x16x1024xbf16, #tpu.memory_space<vmem>>, vector<1x16x1024xbf16>
    %41 = vector.shape_cast %40 : vector<1x16x1024xbf16> to vector<16x1024xbf16>
    %42 = vector.shape_cast %39 : vector<16x1024xbf16> to vector<1x16x1024xbf16>
    tpu.vector_store %arg10[%c0_17, %c0_18, %c0_19], %42 {strides = array<i32>} : memref<1x16x1024xbf16, #tpu.memory_space<vmem>>, vector<1x16x1024xbf16>,
    %cst_20 = arith.constant dense<0xFF800000> : vector<1024xf32>
    %43 = vector.multi_reduction <maximumf>, %38, %cst_20 [0] : vector<16x1024xf32> to vector<1024xf32>
    %44 = vector.shape_cast %43 : vector<1024xf32> to vector<1x1024xf32>
    %c0_i32 = arith.constant 0 : i32
    %45 = arith.cmpi eq, %arg2, %c0_i32 : i32
    %46 = arith.extui %45 : i1 to i32
    %c0_i32_21 = arith.constant 0 : i32
    %47 = arith.cmpi ne, %46, %c0_i32_21 : i32
    scf.if %47 {
      %c0_24 = arith.constant 0 : index
      %c0_25 = arith.constant 0 : index
      %c0_26 = arith.constant 0 : index
      %c0_27 = arith.constant 0 : index
      %51 = vector.load %arg11[%c0_24, %c0_25, %c0_26, %c0_27] : memref<1x1x1x1024xf32, #tpu.memory_space<vmem>>, vector<1x1x1x1024xf32>
      %52 = vector.shape_cast %51 : vector<1x1x1x1024xf32> to vector<1x1024xf32>
      %53 = vector.shape_cast %44 : vector<1x1024xf32> to vector<1x1x1x1024xf32>
      tpu.vector_store %arg11[%c0_24, %c0_25, %c0_26, %c0_27], %53 {strides = array<i32>} : memref<1x1x1x1024xf32, #tpu.memory_space<vmem>>, vector<1x1x1x1024xf32>,
    } else {
    }
    %c0_i32_22 = arith.constant 0 : i32
    %48 = arith.cmpi sgt, %arg2, %c0_i32_22 : i32
    %49 = arith.extui %48 : i1 to i32
    %c0_i32_23 = arith.constant 0 : i32
    %50 = arith.cmpi ne, %49, %c0_i32_23 : i32
    scf.if %50 {
      %c0_24 = arith.constant 0 : index
      %c0_25 = arith.constant 0 : index
      %c0_26 = arith.constant 0 : index
      %c0_27 = arith.constant 0 : index
      %51 = vector.load %arg11[%c0_24, %c0_25, %c0_26, %c0_27] : memref<1x1x1x1024xf32, #tpu.memory_space<vmem>>, vector<1x1x1x1024xf32>
      %52 = vector.shape_cast %51 : vector<1x1x1x1024xf32> to vector<1x1024xf32>
      %53 = arith.maximumf %52, %44 : vector<1x1024xf32>
      %c0_28 = arith.constant 0 : index
      %c0_29 = arith.constant 0 : index
      %c0_30 = arith.constant 0 : index
      %c0_31 = arith.constant 0 : index
      %54 = vector.load %arg11[%c0_28, %c0_29, %c0_30, %c0_31] : memref<1x1x1x1024xf32, #tpu.memory_space<vmem>>, vector<1x1x1x1024xf32>
      %55 = vector.shape_cast %54 : vector<1x1x1x1024xf32> to vector<1x1024xf32>
      %56 = vector.shape_cast %53 : vector<1x1024xf32> to vector<1x1x1x1024xf32>
      tpu.vector_store %arg11[%c0_28, %c0_29, %c0_30, %c0_31], %56 {strides = array<i32>} : memref<1x1x1x1024xf32, #tpu.memory_space<vmem>>, vector<1x1x1x1024xf32>,
    } else {
    }
    return
  }
  func.func @transform_0(%arg0: i32, %arg1: i32, %arg2: i32) -> (i32, i32, i32) {
    %c1_i32 = arith.constant 1 : i32
    %0 = arith.muli %arg1, %c1_i32 : i32
    %1 = arith.addi %0, %arg2 : i32
    %c0_i32 = arith.constant 0 : i32
    %c0_i32_0 = arith.constant 0 : i32
    return %arg0, %1, %c0_i32 : i32, i32, i32
  }
  func.func @transform_1(%arg0: i32, %arg1: i32, %arg2: i32) -> (i32, i32) {
    %c0_i32 = arith.constant 0 : i32
    %c0_i32_0 = arith.constant 0 : i32
    %c0_i32_1 = arith.constant 0 : i32
    return %c0_i32, %c0_i32_0 : i32, i32
  }
  func.func @transform_2(%arg0: i32, %arg1: i32, %arg2: i32) -> (i32, i32) {
    %c0_i32 = arith.constant 0 : i32
    %c0_i32_0 = arith.constant 0 : i32
    %c0_i32_1 = arith.constant 0 : i32
    return %c0_i32, %c0_i32_0 : i32, i32
  }
  func.func @transform_3(%arg0: i32, %arg1: i32, %arg2: i32) -> (i32, i32) {
    %c0_i32 = arith.constant 0 : i32
    %c0_i32_0 = arith.constant 0 : i32
    %c0_i32_1 = arith.constant 0 : i32
    return %c0_i32, %c0_i32_0 : i32, i32
  }
  func.func @transform_4(%arg0: i32, %arg1: i32, %arg2: i32) -> (i32, i32) {
    %c0_i32 = arith.constant 0 : i32
    %c0_i32_0 = arith.constant 0 : i32
    %c0_i32_1 = arith.constant 0 : i32
    return %c0_i32, %c0_i32_0 : i32, i32
  }
  func.func @transform_5(%arg0: i32, %arg1: i32, %arg2: i32) -> (i32, i32) {
    %c0_i32 = arith.constant 0 : i32
    %c0_i32_0 = arith.constant 0 : i32
    %c0_i32_1 = arith.constant 0 : i32
    return %c0_i32, %c0_i32_0 : i32, i32
  }
  func.func @transform_6(%arg0: i32, %arg1: i32, %arg2: i32) -> (i32, i32) {
    %c0_i32 = arith.constant 0 : i32
    %c0_i32_0 = arith.constant 0 : i32
    %c0_i32_1 = arith.constant 0 : i32
    return %c0_i32, %c0_i32_0 : i32, i32
  }
  func.func @transform_7(%arg0: i32, %arg1: i32, %arg2: i32) -> (i32, i32, i32) {
    %c1_i32 = arith.constant 1 : i32
    %0 = arith.muli %arg1, %c1_i32 : i32
    %1 = arith.addi %0, %arg2 : i32
    %c0_i32 = arith.constant 0 : i32
    %c0_i32_0 = arith.constant 0 : i32
    return %arg0, %1, %c0_i32 : i32, i32, i32
  }
  func.func @transform_8(%arg0: i32, %arg1: i32, %arg2: i32) -> (i32, i32, i32, i32) {
    %c0_i32 = arith.constant 0 : i32
    %c0_i32_0 = arith.constant 0 : i32
    %c0_i32_1 = arith.constant 0 : i32
    return %arg0, %arg1, %c0_i32, %c0_i32_0 : i32, i32, i32, i32
  }
}

module attributes {stable_mosaic.version = 11 : i64} {
  func.func @head_kernel(%arg0: i32, %arg1: memref<2x1024xf32, #tpu.memory_space<vmem>>, %arg2: memref<1024x512xbf16, #tpu.memory_space<vmem>>, %arg3: memref<1x512xf32, #tpu.memory_space<vmem>>, %arg4: memref<512x256xbf16, #tpu.memory_space<vmem>>, %arg5: memref<1x256xf32, #tpu.memory_space<vmem>>, %arg6: memref<256x2xf32, #tpu.memory_space<vmem>>, %arg7: memref<1x2xf32, #tpu.memory_space<vmem>>, %arg8: memref<2x2xf32, #tpu.memory_space<vmem>>) attributes {dimension_semantics = [#tpu.dimension_semantics<arbitrary>], iteration_bounds = array<i64: 1>, scalar_prefetch = 0 : i64, scratch_operands = 0 : i64, tpu.core_type = #tpu.core_type<tc>, window_params = [{pipeline_mode = #tpu.pipeline_mode<synchronous>, transform_indices = @transform_0, window_bounds = array<i64: 2, 1024>}, {pipeline_mode = #tpu.pipeline_mode<synchronous>, transform_indices = @transform_1, window_bounds = array<i64: 1024, 512>}, {pipeline_mode = #tpu.pipeline_mode<synchronous>, transform_indices = @transform_2, window_bounds = array<i64: 1, 512>}, {pipeline_mode = #tpu.pipeline_mode<synchronous>, transform_indices = @transform_3, window_bounds = array<i64: 512, 256>}, {pipeline_mode = #tpu.pipeline_mode<synchronous>, transform_indices = @transform_4, window_bounds = array<i64: 1, 256>}, {pipeline_mode = #tpu.pipeline_mode<synchronous>, transform_indices = @transform_5, window_bounds = array<i64: 256, 2>}, {pipeline_mode = #tpu.pipeline_mode<synchronous>, transform_indices = @transform_6, window_bounds = array<i64: 1, 2>}, {pipeline_mode = #tpu.pipeline_mode<synchronous>, transform_indices = @transform_7, window_bounds = array<i64: 2, 2>}]} {
    %c0 = arith.constant 0 : index
    %c0_0 = arith.constant 0 : index
    %0 = vector.load %arg1[%c0, %c0_0] : memref<2x1024xf32, #tpu.memory_space<vmem>>, vector<2x1024xf32>
    %1 = arith.truncf %0 : vector<2x1024xf32> to vector<2x1024xbf16>
    %c0_1 = arith.constant 0 : index
    %c0_2 = arith.constant 0 : index
    %2 = vector.load %arg2[%c0_1, %c0_2] : memref<1024x512xbf16, #tpu.memory_space<vmem>>, vector<1024x512xbf16>
    %cst = arith.constant dense<0.000000e+00> : vector<2x512xf32>
    %3 = tpu.matmul %1, %2, %cst {dimension_numbers = #tpu.dot_dimension_numbers<[1], [0], [0], [1], [0, 0, 1, 1], [], []>} : vector<2x1024xbf16>, vector<1024x512xbf16>, vector<2x512xf32> -> vector<2x512xf32>
    %c0_3 = arith.constant 0 : index
    %c0_4 = arith.constant 0 : index
    %4 = vector.load %arg3[%c0_3, %c0_4] : memref<1x512xf32, #tpu.memory_space<vmem>>, vector<1x512xf32>
    %5 = vector.broadcast %4 : vector<1x512xf32> to vector<2x512xf32>
    %6 = arith.addf %3, %5 : vector<2x512xf32>
    %cst_5 = arith.constant 0.000000e+00 : f32
    %7 = vector.broadcast %cst_5 : f32 to vector<2x512xf32>
    %8 = arith.maximumf %6, %7 : vector<2x512xf32>
    %9 = arith.truncf %8 : vector<2x512xf32> to vector<2x512xbf16>
    %c0_6 = arith.constant 0 : index
    %c0_7 = arith.constant 0 : index
    %10 = vector.load %arg4[%c0_6, %c0_7] : memref<512x256xbf16, #tpu.memory_space<vmem>>, vector<512x256xbf16>
    %cst_8 = arith.constant dense<0.000000e+00> : vector<2x256xf32>
    %11 = tpu.matmul %9, %10, %cst_8 {dimension_numbers = #tpu.dot_dimension_numbers<[1], [0], [0], [1], [0, 0, 1, 1], [], []>} : vector<2x512xbf16>, vector<512x256xbf16>, vector<2x256xf32> -> vector<2x256xf32>
    %c0_9 = arith.constant 0 : index
    %c0_10 = arith.constant 0 : index
    %12 = vector.load %arg5[%c0_9, %c0_10] : memref<1x256xf32, #tpu.memory_space<vmem>>, vector<1x256xf32>
    %13 = vector.broadcast %12 : vector<1x256xf32> to vector<2x256xf32>
    %14 = arith.addf %11, %13 : vector<2x256xf32>
    %cst_11 = arith.constant 0.000000e+00 : f32
    %15 = vector.broadcast %cst_11 : f32 to vector<2x256xf32>
    %16 = arith.maximumf %14, %15 : vector<2x256xf32>
    %c0_12 = arith.constant 0 : index
    %c0_13 = arith.constant 0 : index
    %17 = vector.load %arg6[%c0_12, %c0_13] : memref<256x2xf32, #tpu.memory_space<vmem>>, vector<256x2xf32>
    %cst_14 = arith.constant dense<0.000000e+00> : vector<2x2xf32>
    %18 = tpu.matmul %16, %17, %cst_14 {dimension_numbers = #tpu.dot_dimension_numbers<[1], [0], [0], [1], [0, 0, 1, 1], [], []>} : vector<2x256xf32>, vector<256x2xf32>, vector<2x2xf32> -> vector<2x2xf32>
    %c0_15 = arith.constant 0 : index
    %c0_16 = arith.constant 0 : index
    %19 = vector.load %arg7[%c0_15, %c0_16] : memref<1x2xf32, #tpu.memory_space<vmem>>, vector<1x2xf32>
    %20 = vector.broadcast %19 : vector<1x2xf32> to vector<2x2xf32>
    %21 = arith.addf %18, %20 : vector<2x2xf32>
    %cst_17 = arith.constant dense<0xFF800000> : vector<2xf32>
    %22 = vector.multi_reduction <maximumf>, %21, %cst_17 [1] : vector<2x2xf32> to vector<2xf32>
    %23 = vector.shape_cast %22 : vector<2xf32> to vector<2x1xf32>
    %24 = vector.broadcast %23 : vector<2x1xf32> to vector<2x2xf32>
    %25 = arith.subf %21, %24 : vector<2x2xf32>
    %26 = math.exp %25 : vector<2x2xf32>
    %cst_18 = arith.constant dense<0.000000e+00> : vector<2xf32>
    %27 = vector.multi_reduction <add>, %26, %cst_18 [1] : vector<2x2xf32> to vector<2xf32>
    %28 = vector.shape_cast %27 : vector<2xf32> to vector<2x1xf32>
    %29 = math.log %28 : vector<2x1xf32>
    %30 = vector.broadcast %29 : vector<2x1xf32> to vector<2x2xf32>
    %31 = arith.subf %25, %30 : vector<2x2xf32>
    %c0_19 = arith.constant 0 : index
    %c0_20 = arith.constant 0 : index
    %32 = vector.load %arg8[%c0_19, %c0_20] : memref<2x2xf32, #tpu.memory_space<vmem>>, vector<2x2xf32>
    tpu.vector_store %arg8[%c0_19, %c0_20], %31 {strides = array<i32>} : memref<2x2xf32, #tpu.memory_space<vmem>>, vector<2x2xf32>,
    return
  }
  func.func @transform_0(%arg0: i32) -> (i32, i32) {
    %c0_i32 = arith.constant 0 : i32
    %c0_i32_0 = arith.constant 0 : i32
    %c0_i32_1 = arith.constant 0 : i32
    return %c0_i32, %c0_i32_0 : i32, i32
  }
  func.func @transform_1(%arg0: i32) -> (i32, i32) {
    %c0_i32 = arith.constant 0 : i32
    %c0_i32_0 = arith.constant 0 : i32
    %c0_i32_1 = arith.constant 0 : i32
    return %c0_i32, %c0_i32_0 : i32, i32
  }
  func.func @transform_2(%arg0: i32) -> (i32, i32) {
    %c0_i32 = arith.constant 0 : i32
    %c0_i32_0 = arith.constant 0 : i32
    %c0_i32_1 = arith.constant 0 : i32
    return %c0_i32, %c0_i32_0 : i32, i32
  }
  func.func @transform_3(%arg0: i32) -> (i32, i32) {
    %c0_i32 = arith.constant 0 : i32
    %c0_i32_0 = arith.constant 0 : i32
    %c0_i32_1 = arith.constant 0 : i32
    return %c0_i32, %c0_i32_0 : i32, i32
  }
  func.func @transform_4(%arg0: i32) -> (i32, i32) {
    %c0_i32 = arith.constant 0 : i32
    %c0_i32_0 = arith.constant 0 : i32
    %c0_i32_1 = arith.constant 0 : i32
    return %c0_i32, %c0_i32_0 : i32, i32
  }
  func.func @transform_5(%arg0: i32) -> (i32, i32) {
    %c0_i32 = arith.constant 0 : i32
    %c0_i32_0 = arith.constant 0 : i32
    %c0_i32_1 = arith.constant 0 : i32
    return %c0_i32, %c0_i32_0 : i32, i32
  }
  func.func @transform_6(%arg0: i32) -> (i32, i32) {
    %c0_i32 = arith.constant 0 : i32
    %c0_i32_0 = arith.constant 0 : i32
    %c0_i32_1 = arith.constant 0 : i32
    return %c0_i32, %c0_i32_0 : i32, i32
  }
  func.func @transform_7(%arg0: i32) -> (i32, i32) {
    %c0_i32 = arith.constant 0 : i32
    %c0_i32_0 = arith.constant 0 : i32
    %c0_i32_1 = arith.constant 0 : i32
    return %c0_i32, %c0_i32_0 : i32, i32
  }
}

</mosaic_0001>

<bundles_post_ra>
// kernel: pointnet_cls_forward.2
= control target key start
LH: loop header
LB: loop body
LE: loop exit
PB: predicated region body
PF: predicated region fallthrough
CT: control target
= control target key end

     0   :  { %s2632_s0 = inlined_call_operand.vmem [shape: f32[2,16,8], index: 0, kind: input, shape index: {}]   ;;  %s2633_s1 = inlined_call_operand.hbm [shape: f32[3,64], index: 1, kind: input, shape index: {}]   ;;  %s2634_s2 = inlined_call_operand.hbm [shape: f32[1,64], index: 2, kind: input, shape index: {}]   ;;  %s2635_s3 = inlined_call_operand.vmem [shape: bf16[64,128], index: 3, kind: input, shape index: {}]   ;;  %s2636_s4 = inlined_call_operand.hbm [shape: f32[1,128], index: 4, kind: input, shape index: {}]   ;;  %s2637_s5 = inlined_call_operand.vmem [shape: bf16[128,1024], index: 5, kind: input, shape index: {}]   ;;  %s2638_s6 = inlined_call_operand.hbm [shape: f32[1,1024], index: 6, kind: input, shape index: {}]   ;;  %s2639_s7 = inlined_call_operand.hbm [shape: bf16[2,16,1024], index: 7, kind: output, shape index: {0}]   ;;  %s2640_s8 = inlined_call_operand.vmem [shape: f32[2,1,1,1024], index: 8, kind: output, shape index: {1}]  }
   0x1   :  { %2648 = sst [smem:[#allocation19_spill]] %s2634_s2 }
   0x2   :  { %14 = vsyncpa [#allocation3], 0 }
   0x3   :  { %15 = vsyncpa [#allocation6], 0 }
   0x4   :  { %16 = vsyncpa [#allocation9], 0 }
   0x5   :  { %17 = vsyncpa [#allocation4], 0 }
   0x6   :  { %19 = vsyncpa [#allocation4 + $0x1], 0  ;;  %s2104_s27 = smov 0   ;;  %s2106_s28 = smov 0  }
   0x7   :  { %s2108_s29 = smov 0   ;;  %s2110_s30 = smov 0  }
   0x8   :  { %s2112_s9 = smov 0   ;;  %s2114_s10 = smov 0  }
   0x9 LB: > { %2649 = sst [smem:[#allocation15_spill]] %s2032_s29  ;;  %s1602_s11 = sadd.s32 4294967295, %s2044_s10   ;;  %s2044_s10 = sphi %s2114_s10, %s25_s10   ;;  %s2040_s9 = sphi %s2112_s9, %s2667_s9   ;;  %s2036_s30 = sphi %s2110_s30, %s2670_s30   ;;  %s2032_s29 = sphi %s2108_s29, %s2665_s29   ;;  %s2028_s28 = sphi %s2106_s28, %s2669_s28   ;;  %s2024_s27 = sphi %s2104_s27, %s2668_s27  }
   0xa   : > { %2650 = sst [smem:[#allocation16_spill]] %s2040_s9  ;;  %s1603_s12 = sadd.s32 4294967294, %s2044_s10  }
   0xb   : > { %s44_s13 = sadd.s32 1, %s2040_s9  ;;  %s211_s14 = sadd.s32 1, %s2032_s29 }
   0xc   : > { %p46_p0 = scmp.ge.s32.totalorder %s44_s13, 2  ;;  %p221_p1 = scmp.ne.s32.totalorder %s2032_s29, %s2028_s28 }
   0xd   : > { %p222_p2 = scmp.eq.s32.totalorder %s1602_s11, 1  ;;  %p227_p3 = scmp.ne.s32.totalorder %s2028_s28, %s2024_s27 }
   0xe   : > { %s2672_s13 = smov (%p46_p0, %s44_s13), 0  ;;  %p228_p5 = scmp.eq.s32.totalorder %s1603_s12, 1 }
   0xf   : > { %2651 = sst [smem:[#allocation17_spill]] %s2672_s13  ;;  %p2144_p4 = por %p222_p2, %p221_p1 }
  0x10   : > { %s206_s16 = ssub.s32 %s2040_s9, %s2672_s13  ;;  %p1604_p6 = scmp.ge.s32.totalorder %s2044_s10, 1 }
  0x11   : > { %s2652_s15 = scalar_select %p2144_p4, 1, 0 }
  0x12   : > { %p209_p7 = scmp.eq.s32.totalorder %s206_s16, 0  ;;  %p2151_p8 = por %p228_p5, %p227_p3 }
  0x13   : > { %p263_p9 = scmp.lt.s32.totalorder %s2044_s10, 3  ;;  %p2163_p11 = scmp.eq.s32.totalorder %s1602_s11, 0 }
  0x14   : > { %s2653_s17 = scalar_select %p2151_p8, 1, 0 }
  0x15   : > { %s2157_s18 = scalar_select %p209_p7, %s2032_s29, %s211_s14  }
  0x16   : > { %p2159_p10 = pnand %p1604_p6, %p263_p9  ;;  %s2046_s21 = smov [#allocation5]  }
  0x17   : > { %2654 = sst [smem:[#allocation18_spill]] %s2157_s18  ;;  %s287_s22 = sshll.u32 %s2046_s21, 4  ;;  %s288_s22 = int_to_ptr.vmem [resolvable:$true] %s287_s22 }
  0x18   : > { %s2655_s19 = scalar_select %p2159_p10, 1, 0 }
  0x19   : > { %s2656_s20 = scalar_select %p2163_p11, 1, 0 }
  0x1a   : > { %p1748_p12 = pneg %p2159_p10  ;;  %s2047_s24 = smov [#allocation2]  }
  0x1b   : > { %s276_s25 = sshll.u32 %s2047_s24, 4  ;;  %s2658_s2 = sld [smem:[#allocation19_spill]]  ;;  %s2175_s25 = int_to_ptr.vmem [resolvable:$true] %s276_s25 }
  0x1c   : > { %p2171_p13 = pnand %p2163_p11, %p1748_p12 }
  0x1e   : > { %p2185_p1 = pneg %p2171_p13 }
  0x21   : > { %s1842_s12 = scalar_lea.hbm %s2658_s2, 16 }
  0x22   : > { %p1843_p0 = scmp.ne.s32.totalorder %s2658_s2, %s1842_s12  ;;  %p1849_p5 = scmp.lt.u32.totalorder %s1842_s12, %s2658_s2 }
  0x24   : > { %p1845_p2 = pnand %p2185_p1, %p1843_p0 }
  0x26   : > { %p1846_p3 = pneg %p1845_p2 }
  0x28   : > { %p1851_p6 = pnand %p1849_p5, %p1846_p3 }
  0x2a   : > { %1854 = shalt.err (!%p1851_p6)
}
  0x2b   : > { %s1855_s26 = scalar_lea.vmem %s288_s22, 16  ;;  %s1862_s11 = scalar_lea.vmem %s288_s22, 32 }
  0x2c   : > { %p1856_p7 = scmp.ne.s32.totalorder %s288_s22, %s1855_s26  ;;  %p1863_p8 = scmp.lt.s32.totalorder %s288_s22, %s288_s22 }
  0x2d   : > { %p1864_p4 = scmp.lt.s32.totalorder %s1862_s11, %s1855_s26 }
  0x2e   : > { %p1858_p9 = pnand %p1856_p7, %p2185_p1 }
  0x2f   : > { %p1865_p11 = por %p1864_p4, %p1863_p8 }
  0x30   : > { %p1859_p12 = pneg %p1858_p9 }
  0x32   : > { %p1866_p10 = pnand %p1865_p11, %p1859_p12 }
  0x34   : > { %1869 = shalt.err (!%p1866_p10)
}
  0x35   : > { %1754 = dma.hbm_to_vmem [thread:$0]  (!%p2171_p13), %s2658_s2, 16, %s288_s22, [#allocation6]  }
  0x36   : > { %s1870_s24 = scalar_lea.hbm %s2633_s1, 64 }
  0x37   : > { %p1871_p0 = scmp.ne.s32.totalorder %s2633_s1, %s1870_s24  ;;  %p1877_p8 = scmp.lt.u32.totalorder %s1870_s24, %s2633_s1 }
  0x39   : > { %p1873_p2 = pnand %p1871_p0, %p2185_p1 }
  0x3b   : > { %p1874_p4 = pneg %p1873_p2 }
  0x3d   : > { %p1879_p10 = pnand %p1877_p8, %p1874_p4 }
  0x3f   : > { %1882 = shalt.err (!%p1879_p10)
}
  0x40   : > { %s1883_s22 = scalar_lea.vmem %s2175_s25, 64  ;;  %p1891_p6 = scmp.lt.s32.totalorder %s2175_s25, %s2175_s25 }
  0x41   : > { %p1884_p11 = scmp.ne.s32.totalorder %s2175_s25, %s1883_s22  ;;  %p1892_p7 = scmp.lt.s32.totalorder %s1883_s22, %s1883_s22 }
  0x43   : > { %p1886_p3 = pnand %p1884_p11, %p2185_p1  ;;  %p1893_p9 = por %p1892_p7, %p1891_p6 }
  0x45   : > { %p1887_p5 = pneg %p1886_p3 }
  0x47   : > { %p1894_p12 = pnand %p1893_p9, %p1887_p5 }
  0x49   : > { %1897 = shalt.err (!%p1894_p12)
}
  0x4a   : > { %1751 = dma.hbm_to_vmem [thread:$0]  (!%p2171_p13), %s2633_s1, 64, %s2175_s25, [#allocation3]  }
  0x4b   : > { %s2048_s14 = smov [#allocation7]   ;;  %s2049_s13 = smov [#allocation8]  }
  0x4c   : > { %s301_s16 = sshll.u32 %s2048_s14, 4  ;;  %s315_s12 = sshll.u32 %s2049_s13, 4  ;;  %s302_s16 = int_to_ptr.vmem [resolvable:$true] %s301_s16  ;;  %s316_s12 = int_to_ptr.vmem [resolvable:$true] %s315_s12 }
  0x4d   : > { %s1898_s11 = scalar_lea.hbm %s2636_s4, 16 }
  0x4e   : > { %p1899_p0 = scmp.ne.s32.totalorder %s2636_s4, %s1898_s11  ;;  %p1905_p8 = scmp.lt.u32.totalorder %s1898_s11, %s2636_s4 }
  0x50   : > { %p1901_p2 = pnand %p1899_p0, %p2185_p1 }
  0x52   : > { %p1902_p4 = pneg %p1901_p2 }
  0x54   : > { %p1907_p10 = pnand %p1905_p8, %p1902_p4 }
  0x56   : > { %1910 = shalt.err (!%p1907_p10)
}
  0x57   : > { %s1911_s25 = scalar_lea.vmem %s302_s16, 16  ;;  %s1918_s18 = scalar_lea.vmem %s302_s16, 32 }
  0x58   : > { %p1912_p11 = scmp.ne.s32.totalorder %s302_s16, %s1911_s25  ;;  %p1919_p6 = scmp.lt.s32.totalorder %s302_s16, %s302_s16 }
  0x59   : > { %p1920_p7 = scmp.lt.s32.totalorder %s1918_s18, %s1911_s25 }
  0x5a   : > { %p1914_p3 = pnand %p1912_p11, %p2185_p1 }
  0x5b   : > { %p1921_p9 = por %p1920_p7, %p1919_p6 }
  0x5c   : > { %p1915_p5 = pneg %p1914_p3 }
  0x5e   : > { %p1922_p12 = pnand %p1921_p9, %p1915_p5 }
  0x60   : > { %1925 = shalt.err (!%p1922_p12)
}
  0x61   : > { %1757 = dma.hbm_to_vmem [thread:$0]  (!%p2171_p13), %s2636_s4, 16, %s302_s16, [#allocation6]  }
  0x62   : > { %s1926_s24 = scalar_lea.hbm %s2638_s6, 128 }
  0x63   : > { %p1927_p0 = scmp.ne.s32.totalorder %s2638_s6, %s1926_s24  ;;  %p1933_p8 = scmp.lt.u32.totalorder %s1926_s24, %s2638_s6 }
  0x65   : > { %p1929_p2 = pnand %p1927_p0, %p2185_p1 }
  0x67   : > { %p1930_p4 = pneg %p1929_p2 }
  0x69   : > { %p1935_p10 = pnand %p1933_p8, %p1930_p4 }
  0x6b   : > { %1938 = shalt.err (!%p1935_p10)
}
  0x6c   : > { %s1939_s25 = scalar_lea.vmem %s316_s12, 128  ;;  %p1947_p6 = scmp.lt.s32.totalorder %s316_s12, %s316_s12 }
  0x6d   : > { %p1940_p11 = scmp.ne.s32.totalorder %s316_s12, %s1939_s25  ;;  %p1948_p7 = scmp.lt.s32.totalorder %s1939_s25, %s1939_s25 }
  0x6f   : > { %p1942_p3 = pnand %p1940_p11, %p2185_p1  ;;  %p1949_p9 = por %p1948_p7, %p1947_p6 }
  0x71   : > { %p1943_p5 = pneg %p1942_p3 }
  0x73   : > { %p1950_p12 = pnand %p1949_p9, %p1943_p5 }
  0x75   : > { %1953 = shalt.err (!%p1950_p12)
}
  0x76   : > { %1760 = dma.hbm_to_vmem [thread:$0]  (!%p2171_p13), %s2638_s6, 128, %s316_s12, [#allocation9]  }
  0x77   : > { %p2660_p0 = scmp.ne.s32.totalorder %s2655_s19, 0 }
  0x78   : > { %p2661_p2 = scmp.ne.s32.totalorder (!%p2660_p0), %s2656_s20, 0 }
  0x79   : > { %343 = sbr.rel (%p2660_p0) target bundleno = 793 (0x319), region = 48 }
  0x80   : > { %2007 = dma.done.wait (%p2661_p2), [#allocation3], 64  }
  0x81   : > { %2009 = vsyncadd (%p2661_p2), [#allocation3], 4294967232 }
  0x82   : > { %2011 = dma.done.wait (%p2661_p2), [#allocation6], 32  }
  0x83   : > { %2013 = vsyncadd (%p2661_p2), [#allocation6], 4294967264 }
  0x84   : > { %2015 = dma.done.wait (%p2661_p2), [#allocation9], 128  }
  0x85   : > { %2017 = vsyncadd (%p2661_p2), [#allocation9], 4294967168  ;;  %p404_p13 = scmp.lt.s32.totalorder %s2036_s30, 1  ;;  %v2050_v0 = vmov 1   ;;  %v2051_v1 = vmov 0   ;;  %v1838_v4 = vld [vmem:[%s2635_s3] sm:$0xff]   ;;  %v438_v38 = vlaneseq }
  0x86   : > { %1835 = vset.pattern.permute.xlu1 %v2050_v0  ;;  %1834 = vset.pattern.permute.xlu0 %v2051_v1  ;;  %v2052_v5 = vmov 0.0   ;;  %v1839_v6 = vld [vmem:[%s2635_s3 + $0x8] sm:$0xff]   ;;  %v2053_v7 = vmov 2   ;;  %v1840_v8 = vld [vmem:[%s2635_s3 + $0x10] sm:$0xff]   ;;  %v1841_v9 = vld [vmem:[%s2635_s3 + $0x18] sm:$0xff]   ;;  %vm2054_vm0 = vmmov 0  }
  0x87   : > { %s2277_s19 = scalar_select %p404_p13, %s2036_s30, 1  ;;  %1033 = vmatprep.mubr.bf16.mxu1 %v2051_v1  ;;  %1718 = vmatprep.subr.bf16.mxu0 %v2052_v5  ;;  %v575_v10 = vld [vmem:[%s2637_s5] sm:$0xff]  ;;  %v2305_v12 = vld [vmem:[%s2637_s5 + $0x8] sm:$0xff]  ;;  %v2346_v39 = vshrl.u32 %v438_v38, 7  ;;  %vm527_vm1 = vcmask 523264  }
  0x88   : > { %1719 = vmatpush3.bf16.msra.mxu0 %v1838_v4  ;;  %1726 = vmatprep.mubr.msk.bf16.mxu0 %vm2054_vm0, %v2052_v5  ;;  %v579_v11 = vld [vmem:[%s2637_s5 + $0x20] sm:$0xff]  ;;  %v2310_v14 = vld [vmem:[%s2637_s5 + $0x28] sm:$0xff]  ;;  %s389_s9 = sand.u32 1, %s2028_s28   ;;  %p2662_p4 = scmp.ne.s32.totalorder %s2652_s15, 0 }
  0x89   : > { %s1703_s23 = sshll.u32 %s2277_s19, 4  ;;  %1720 = vmatprep.subr.bf16.mxu0 %v2052_v5  ;;  %v1627_v13 = vcombine.high %v575_v10, %v579_v11  ;;  %v1626_v15 = vcombine.low %v575_v10, %v579_v11  ;;  %v583_v16 = vld [vmem:[%s2637_s5 + $0x40] sm:$0xff]  ;;  %v1628_v18 = vcombine.low %v2305_v12, %v2310_v14  ;;  %v1629_v19 = vcombine.high %v2305_v12, %v2310_v14  ;;  %v588_v4 = vld [vmem:[%s2637_s5 + $0x68] sm:$0xff]  ;;  %s1615_s25 = sshll.u32 %s389_s9, 6 }
  0x8a   : > { %s411_s2 = scalar_lea.vmem %s2632_s0, %s1703_s23  ;;  %v587_v17 = vld [vmem:[%s2637_s5 + $0x60] sm:$0xff]  ;;  %v454_v40 = vsub.s32 1, %v2346_v39  ;;  %v440_v41 = vsub.s32 0, %v2346_v39  ;;  %v470_v45 = vsub.s32 2, %v2346_v39  ;;  %v596_v10 = vld [vmem:[%s2637_s5 + $0xa8] sm:$0xff]  ;;  %s2535_s16 = scalar_lea.vmem [#allocation10], %s1615_s25 }
  0x8b   : > { %v425_v2 = vld [vmem:[%s411_s2] sm:$0xff]  ;;  %v426_v3 = vld [vmem:[%s411_s2 + $0x8] sm:$0xff]  ;;  %v1635_v20 = vcombine.high %v583_v16, %v587_v17  ;;  %1001 = vmatprep.subr.bf16.mxu1 %v1627_v13  ;;  %v1634_v21 = vcombine.low %v583_v16, %v587_v17  ;;  %s1439_s18 = sshll.u32 %s2535_s16, 4  ;;  %s1712_s23 = sshll.u32 %s2036_s30, 10  ;;  %s2562_s18 = int_to_ptr.vmem [resolvable:$true] %s1439_s18 }
  0x8c   : > { %445 = vperm.xlu1 %1835, %v425_v2   ;;  %430 = vperm.xlu0 %1834, %v425_v2   ;;  %v591_v22 = vld [vmem:[%s2637_s5 + $0x80] sm:$0xff]  ;;  %v604_v16 = vld [vmem:[%s2637_s5 + $0xe8] sm:$0xff]  ;;  %s2567_s2 = scalar_lea.hbm %s2639_s7, %s1712_s23  ;;  %s2575_s30 = scalar_lea.sflag [#allocation4], %s389_s9 }
  0x8d   : > { %1721 = vmatpush3.bf16.msra.mxu0 %v1839_v6  ;;  %1002 = vmatpush1.bf16.msra.mxu1 %v1626_v15  ;;  %v595_v23 = vld [vmem:[%s2637_s5 + $0xa0] sm:$0xff]  ;;  %v600_v15 = vld [vmem:[%s2637_s5 + $0xc8] sm:$0xff]  ;;  %s1954_s20 = scalar_lea.vmem %s2562_s18, 1024  ;;  %s2056_s14 = smov [#allocation10]  }
  0x8e   : > { %1722 = vmatprep.subr.bf16.mxu0 %v2052_v5  ;;  %1003 = vmatprep.subr.bf16.mxu1 %v1635_v20  ;;  %v1643_v24 = vcombine.high %v591_v22, %v595_v23  ;;  %v1642_v25 = vcombine.low %v591_v22, %v595_v23  ;;  %v599_v26 = vld [vmem:[%s2637_s5 + $0xc0] sm:$0xff]  ;;  %v608_v12 = vld [vmem:[%s2637_s5 + $0x108] sm:$0xff]  ;;  %p1955_p1 = scmp.ne.s32.totalorder %s2562_s18, %s1954_s20  ;;  %s1958_s29 = sshll.u32 %s2056_s14, 4  ;;  %s1959_s29 = int_to_ptr.vmem [resolvable:$false] %s1958_s29 }
  0x8f   : > { %v603_v27 = vld [vmem:[%s2637_s5 + $0xe0] sm:$0xff]  ;;  %v612_v14 = vld [vmem:[%s2637_s5 + $0x128] sm:$0xff]  ;;  %s1960_s13 = scalar_lea.vmem %s1959_s29, 2048  ;;  %p1961_p11 = scmp.lt.s32.totalorder %s2562_s18, %s1959_s29 }
  0x90   : > { %449 = vperm.xlu1 %1835, %v426_v3   ;;  %435 = vperm.xlu0 %1834, %v426_v3   ;;  %v1651_v28 = vcombine.high %v599_v26, %v603_v27  ;;  %v1650_v29 = vcombine.low %v599_v26, %v603_v27  ;;  %v607_v30 = vld [vmem:[%s2637_s5 + $0x100] sm:$0xff]  ;;  %v1661_v20 = vcombine.high %v608_v12, %v612_v14  ;;  %v620_v22 = vld [vmem:[%s2637_s5 + $0x168] sm:$0xff]  ;;  %p1956_p8 = pnand %p1955_p1, %p2662_p4  ;;  %p1962_p3 = scmp.lt.s32.totalorder %s1960_s13, %s1954_s20 }
  0x91   : > { %1723 = vmatpush3.bf16.msra.mxu0 %v1840_v8  ;;  %1004 = vmatpush1.bf16.msra.mxu1 %v1634_v21  ;;  %v611_v31 = vld [vmem:[%s2637_s5 + $0x120] sm:$0xff]  ;;  %v616_v21 = vld [vmem:[%s2637_s5 + $0x148] sm:$0xff]  ;;  %v1660_v23 = vcombine.low %v608_v12, %v612_v14  ;;  %v602_v12 = vld [vmem:[%s2637_s5 + $0xd8] sm:$0xff] }
  0x92   : > { %1724 = vmatprep.subr.bf16.mxu0 %v2052_v5  ;;  %1005 = vmatprep.subr.bf16.mxu1 %v1643_v24  ;;  %v1659_v32 = vcombine.high %v607_v30, %v611_v31  ;;  %v1658_v33 = vcombine.low %v607_v30, %v611_v31  ;;  %v615_v34 = vld [vmem:[%s2637_s5 + $0x140] sm:$0xff]  ;;  %v1669_v24 = vcombine.high %v616_v21, %v620_v22  ;;  %v628_v30 = vld [vmem:[%s2637_s5 + $0x1a8] sm:$0xff]  ;;  %v606_v14 = vld [vmem:[%s2637_s5 + $0xf8] sm:$0xff]  ;;  %p1957_p10 = pneg %p1956_p8  ;;  %p1963_p5 = por %p1962_p3, %p1961_p11 }
  0x93   : > { %v619_v35 = vld [vmem:[%s2637_s5 + $0x160] sm:$0xff]  ;;  %v636_v38 = vld [vmem:[%s2637_s5 + $0x1e8] sm:$0xff] }
  0x94   : > { %1837 = vset.pattern.permute.xlu1 %v2053_v7  ;;  %1836 = vset.pattern.permute.xlu0 %v2053_v7  ;;  %v1667_v36 = vcombine.high %v615_v34, %v619_v35  ;;  %v1666_v37 = vcombine.low %v615_v34, %v619_v35  ;;  %v427_v42 = vld [vmem:[#allocation2] sm:$0x7]  ;;  %v1619_v61 = vld [vmem:[#allocation5] ss:$0 sm:$0xff]  ;;  %p1964_p6 = pnand %p1963_p5, %p1957_p10 }
  0x95   : > { %465 = vperm.xlu1 %1837, %v426_v3   ;;  %461 = vperm.xlu0 %1836, %v425_v2   ;;  %v455_v46 = vrot.slane %v427_v42, %v454_v40  ;;  %v441_v47 = vrot.slane %v427_v42, %v440_v41  ;;  %v471_v50 = vrot.slane %v427_v42, %v470_v45  ;;  %v584_v3 = vld [vmem:[%s2637_s5 + $0x48] sm:$0xff]  ;;  %v623_v26 = vld [vmem:[%s2637_s5 + $0x180] sm:$0xff] }
  0x96   : > { %1725 = vmatpush3.bf16.msra.mxu0 %v1841_v9  ;;  %1006 = vmatpush1.bf16.msra.mxu1 %v1642_v25  ;;  %v1637_v8 = vcombine.high %v584_v3, %v588_v4  ;;  %v592_v9 = vld [vmem:[%s2637_s5 + $0x88] sm:$0xff]  ;;  %v1636_v11 = vcombine.low %v584_v3, %v588_v4  ;;  %v1668_v25 = vcombine.low %v616_v21, %v620_v22  ;;  %v627_v27 = vld [vmem:[%s2637_s5 + $0x1a0] sm:$0xff] }
  0x97   : > { %1044 = vmatprep.subr.bf16.mxu0 %v1629_v19  ;;  %1007 = vmatprep.subr.bf16.mxu1 %v1651_v28  ;;  %v1645_v13 = vcombine.high %v592_v9, %v596_v10  ;;  %v1644_v17 = vcombine.low %v592_v9, %v596_v10  ;;  %v1653_v19 = vcombine.high %v600_v15, %v604_v16  ;;  %v624_v28 = vld [vmem:[%s2637_s5 + $0x188] sm:$0xff]  ;;  %v631_v34 = vld [vmem:[%s2637_s5 + $0x1c0] sm:$0xff]  ;;  %v594_v9 = vld [vmem:[%s2637_s5 + $0x98] sm:$0xff] }
  0x98   : > { %v1676_v31 = vcombine.low %v624_v28, %v628_v30  ;;  %v635_v35 = vld [vmem:[%s2637_s5 + $0x1e0] sm:$0xff]  ;;  %v598_v10 = vld [vmem:[%s2637_s5 + $0xb8] sm:$0xff]  ;;  %v1657_v22 = vcombine.high %v602_v12, %v606_v14 }
  0x9a   : > { %1008 = vmatpush1.bf16.msra.mxu1 %v1650_v29  ;;  %v1675_v29 = vcombine.high %v623_v26, %v627_v27 }
  0x9b   : > { %1009 = vmatprep.subr.bf16.mxu1 %v1659_v32  ;;  %v1677_v32 = vcombine.high %v624_v28, %v628_v30  ;;  %v617_v30 = vld [vmem:[%s2637_s5 + $0x150] sm:$0xff] }
  0x9e   : > { %1010 = vmatpush1.bf16.msra.mxu1 %v1658_v33  ;;  %v1674_v33 = vcombine.low %v623_v26, %v627_v27  ;;  %v1656_v27 = vcombine.low %v602_v12, %v606_v14 }
  0x9f   : > { %1011 = vmatprep.subr.bf16.mxu1 %v1667_v36  ;;  %v632_v36 = vld [vmem:[%s2637_s5 + $0x1c8] sm:$0xff] }
  0xa0   : > { %v1684_v42 = vcombine.low %v632_v36, %v636_v38 }
  0xa2   : > { %1012 = vmatpush1.bf16.msra.mxu1 %v1666_v37  ;;  %v1683_v37 = vcombine.high %v631_v34, %v635_v35 }
  0xa3   : > { %1013 = vmatprep.subr.bf16.mxu1 %v1675_v29 }
  0xa6   : > { %1014 = vmatpush1.bf16.msra.mxu1 %v1674_v33  ;;  %v622_v33 = vld [vmem:[%s2637_s5 + $0x178] sm:$0xff] }
  0xa7   : > { %1015 = vmatprep.subr.bf16.mxu1 %v1683_v37 }
 0x10b   : > { %v446_v43 = vpop.permute.xlu1 %445  ;;  %v431_v44 = vpop.permute.xlu0 %430 }
 0x10c   : > { %v456_v51 = vmul.f32 %v455_v46, %v446_v43  ;;  %v442_v52 = vmul.f32 %v441_v47, %v431_v44  ;;  %v1685_v43 = vcombine.high %v632_v36, %v636_v38  ;;  %v1682_v44 = vcombine.low %v631_v34, %v635_v35  ;;  %v625_v38 = vld [vmem:[%s2637_s5 + $0x190] sm:$0xff] }
 0x10e   : > { %v458_v57 = vadd.f32 %v456_v51, %v442_v52  ;;  %1016 = vmatpush1.bf16.msra.mxu1 %v1682_v44  ;;  %v630_v44 = vld [vmem:[%s2637_s5 + $0x1b8] sm:$0xff] }
 0x10f   : > { %v450_v48 = vpop.permute.xlu1 %449  ;;  %v436_v49 = vpop.permute.xlu0 %435 }
 0x110   : > { %v457_v53 = vmul.f32 %v455_v46, %v450_v48  ;;  %v443_v54 = vmul.f32 %v441_v47, %v436_v49  ;;  %v577_v46 = vld [vmem:[%s2637_s5 + $0x10] sm:$0xff]  ;;  %v578_v48 = vld [vmem:[%s2637_s5 + $0x18] sm:$0xff] }
 0x111   : > { %v581_v47 = vld [vmem:[%s2637_s5 + $0x30] sm:$0xff] }
 0x112   : > { %v459_v58 = vadd.f32 %v457_v53, %v443_v54  ;;  %v1631_v49 = vcombine.high %v577_v46, %v581_v47  ;;  %v1630_v51 = vcombine.low %v577_v46, %v581_v47  ;;  %v1620_v54 = vld [vmem:[#allocation7] ss:$0 sm:$0xff] }
 0x114   : > { %v466_v55 = vpop.permute.xlu1 %465  ;;  %v462_v56 = vpop.permute.xlu0 %461  ;;  %1087 = vmatprep.subr.bf16.mxu1 %v1631_v49 }
 0x115   : > { %v473_v59 = vmul.f32 %v471_v50, %v466_v55  ;;  %v472_v60 = vmul.f32 %v471_v50, %v462_v56  ;;  %v582_v50 = vld [vmem:[%s2637_s5 + $0x38] sm:$0xff] }
 0x116   : > { %v1632_v52 = vcombine.low %v578_v48, %v582_v50  ;;  %v1633_v53 = vcombine.high %v578_v48, %v582_v50  ;;  %v633_v50 = vld [vmem:[%s2637_s5 + $0x1d0] sm:$0xff] }
 0x117   : > { %v475_v62 = vadd.f32 %v473_v59, %v459_v58  ;;  %v474_v63 = vadd.f32 %v472_v60, %v458_v57 }
 0x119   : > { %v484_v0 = vadd.f32 %v1619_v61, %v475_v62  ;;  %v483_v2 = vadd.f32 %v1619_v61, %v474_v63  ;;  %v585_v61 = vld [vmem:[%s2637_s5 + $0x50] sm:$0xff]  ;;  %v586_v63 = vld [vmem:[%s2637_s5 + $0x58] sm:$0xff] }
 0x11a   : > { %v589_v62 = vld [vmem:[%s2637_s5 + $0x70] sm:$0xff] }
 0x11b   : > { %v486_v5 = vmax.f32 %v484_v0, 0.0  ;;  %v485_v6 = vmax.f32 %v483_v2, 0.0  ;;  %v590_v0 = vld [vmem:[%s2637_s5 + $0x78] sm:$0xff] }
 0x11d   : > { %v487_v7 = vpack.c.bf16 %v486_v5, %v485_v6  ;;  %v1639_v5 = vcombine.high %v585_v61, %v589_v62  ;;  %v1641_v6 = vcombine.high %v586_v63, %v590_v0 }
 0x11f   : > { %1727 = vmatmul.mubr.msk.bf16.vlgmr.msra.gmra.mrb[0].mxu0 %vm527_vm1, %v487_v7  ;;  %v593_v7 = vld [vmem:[%s2637_s5 + $0x90] sm:$0xff] }
 0x120   : > { %1045 = vmatpush1.bf16.msra.mxu0 %v1628_v18  ;;  %1076 = vmatprep.mubr.bf16.mxu0 %v2051_v1  ;;  %v1652_v18 = vcombine.low %v600_v15, %v604_v16  ;;  %v1649_v16 = vcombine.high %v594_v9, %v598_v10 }
 0x121   : > { %1046 = vmatprep.subr.bf16.mxu0 %v1637_v8  ;;  %v597_v8 = vld [vmem:[%s2637_s5 + $0xb0] sm:$0xff] }
 0x122   : > { %v1647_v15 = vcombine.high %v593_v7, %v597_v8 }
 0x124   : > { %1047 = vmatpush1.bf16.msra.mxu0 %v1636_v11  ;;  %v1638_v11 = vcombine.low %v585_v61, %v589_v62  ;;  %v655_v61 = vsub.s32 3, %v2346_v39 }
 0x125   : > { %1048 = vmatprep.subr.bf16.mxu0 %v1645_v13  ;;  %v1640_v13 = vcombine.low %v586_v63, %v590_v0 }
 0x128   : > { %1049 = vmatpush1.bf16.msra.mxu0 %v1644_v17  ;;  %v601_v17 = vld [vmem:[%s2637_s5 + $0xd0] sm:$0xff] }
 0x129   : > { %1050 = vmatprep.subr.bf16.mxu0 %v1653_v19  ;;  %v605_v19 = vld [vmem:[%s2637_s5 + $0xf0] sm:$0xff] }
 0x12a   : > { %v1655_v21 = vcombine.high %v601_v17, %v605_v19  ;;  %v1654_v26 = vcombine.low %v601_v17, %v605_v19 }
 0x12c   : > { %1051 = vmatpush1.bf16.msra.mxu0 %v1652_v18  ;;  %v1646_v18 = vcombine.low %v593_v7, %v597_v8 }
 0x12d   : > { %1052 = vmatprep.subr.bf16.mxu0 %v1661_v20  ;;  %v1648_v20 = vcombine.low %v594_v9, %v598_v10 }
 0x130   : > { %1053 = vmatpush1.bf16.msra.mxu0 %v1660_v23  ;;  %v609_v23 = vld [vmem:[%s2637_s5 + $0x110] sm:$0xff] }
 0x131   : > { %1054 = vmatprep.subr.bf16.mxu0 %v1669_v24  ;;  %v613_v24 = vld [vmem:[%s2637_s5 + $0x130] sm:$0xff] }
 0x132   : > { %v1663_v28 = vcombine.high %v609_v23, %v613_v24  ;;  %v1662_v34 = vcombine.low %v609_v23, %v613_v24 }
 0x134   : > { %1055 = vmatpush1.bf16.msra.mxu0 %v1668_v25  ;;  %v614_v25 = vld [vmem:[%s2637_s5 + $0x138] sm:$0xff] }
 0x135   : > { %1056 = vmatprep.subr.bf16.mxu0 %v1677_v32  ;;  %v618_v32 = vld [vmem:[%s2637_s5 + $0x158] sm:$0xff] }
 0x136   : > { %v1673_v37 = vcombine.high %v618_v32, %v622_v33  ;;  %v1672_v47 = vcombine.low %v618_v32, %v622_v33 }
 0x138   : > { %1057 = vmatpush1.bf16.msra.mxu0 %v1676_v31  ;;  %v621_v31 = vld [vmem:[%s2637_s5 + $0x170] sm:$0xff] }
 0x139   : > { %1058 = vmatprep.subr.bf16.mxu0 %v1685_v43  ;;  %v1671_v36 = vcombine.high %v617_v30, %v621_v31  ;;  %v626_v43 = vld [vmem:[%s2637_s5 + $0x198] sm:$0xff]  ;;  %v1670_v46 = vcombine.low %v617_v30, %v621_v31  ;;  %v2055_v30 = vmov 1966171168  }
 0x13a   : > { %v1681_v49 = vcombine.high %v626_v43, %v630_v44  ;;  %v1302_v31 = vunpack.c.l.s4 %v2055_v30 }
 0x13c   : > { %1059 = vmatpush1.bf16.msra.mxu0 %v1684_v42  ;;  %v629_v42 = vld [vmem:[%s2637_s5 + $0x1b0] sm:$0xff] }
 0x13d   : > { %1130 = vmatprep.subr.bf16.mxu0 %v1633_v53  ;;  %v1679_v48 = vcombine.high %v625_v38, %v629_v42  ;;  %v638_v53 = vld [vmem:[%s2637_s5 + $0x1f8] sm:$0xff] }
 0x1f2   : > { %v565_v55 = vpop.f32.mrb[0].mxu0 }
 0x1f3   : > { %v566_v56 = vadd.f32 %v1620_v54, %v565_v55  ;;  %v1728_v57 = vpop.f32.mrb[1].mxu0  ;;  %v1680_v55 = vcombine.low %v626_v43, %v630_v44  ;;  %v1303_v43 = vunpack.c.0.s8 %v1302_v31 }
 0x1f4   : > { %v568_v58 = vpop.f32.mrb[2].mxu0 }
 0x1f5   : > { %v569_v59 = vadd.f32 %v1620_v54, %v568_v58  ;;  %v1729_v60 = vpop.f32.mrb[3].mxu0  ;;  %v572_v2 = vmax.f32 %v566_v56, 0.0  ;;  %v1678_v54 = vcombine.low %v625_v38, %v629_v42 }
 0x1f6   : > { %v2519_v60 = vld [vmem:[#allocation8] sm:$0xff] }
 0x1f7   : > { %v573_v3 = vmax.f32 %v569_v59, 0.0  ;;  %v644_v62 = vrot.slane %v2519_v60, %v440_v41  ;;  %v652_v63 = vrot.slane %v2519_v60, %v470_v45  ;;  %v648_v0 = vrot.slane %v2519_v60, %v454_v40 }
 0x1f9   : > { %v2439_v4 = vpack.c.bf16 %v573_v3, %v572_v2  ;;  %v656_v2 = vrot.slane %v2519_v60, %v655_v61  ;;  %v659_v61 = vsub.s32 4, %v2346_v39 }
 0x1fb   : > { %1034 = vmatmul.mubr.bf16.vlgmr.msra.gmra.mrb[0].mxu1 %v2439_v4  ;;  %1077 = vmatmul.mubr.bf16.vlgmr.msra.gmra.mrb[4].mxu0 %v2439_v4 }
 0x1fc   : > { %1088 = vmatpush1.bf16.msra.mxu1 %v1630_v51  ;;  %1131 = vmatpush1.bf16.msra.mxu0 %v1632_v52  ;;  %v637_v51 = vld [vmem:[%s2637_s5 + $0x1f0] sm:$0xff]  ;;  %v634_v52 = vld [vmem:[%s2637_s5 + $0x1d8] sm:$0xff] }
 0x1fd   : > { %1089 = vmatprep.subr.bf16.mxu1 %v1639_v5  ;;  %1132 = vmatprep.subr.bf16.mxu0 %v1641_v6  ;;  %v1687_v56 = vcombine.high %v633_v50, %v637_v51  ;;  %v1689_v57 = vcombine.high %v634_v52, %v638_v53  ;;  %v1686_v58 = vcombine.low %v633_v50, %v637_v51 }
 0x1fe   : > { %1119 = vmatprep.mubr.bf16.mxu1 %v2051_v1  ;;  %1162 = vmatprep.mubr.bf16.mxu0 %v2051_v1  ;;  %v610_v1 = vld [vmem:[%s2637_s5 + $0x118] sm:$0xff]  ;;  %v1688_v59 = vcombine.low %v634_v52, %v638_v53  ;;  %v2542_v53 = vsub.s32 %v1303_v43, %v2346_v39 }
 0x1ff   : > { %v1665_v29 = vcombine.high %v610_v1, %v614_v25  ;;  %v1664_v35 = vcombine.low %v610_v1, %v614_v25 }
 0x200   : > { %1090 = vmatpush1.bf16.msra.mxu1 %v1638_v11  ;;  %1133 = vmatpush1.bf16.msra.mxu0 %v1640_v13 }
 0x201   : > { %1091 = vmatprep.subr.bf16.mxu1 %v1647_v15  ;;  %1134 = vmatprep.subr.bf16.mxu0 %v1649_v16 }
 0x204   : > { %1092 = vmatpush1.bf16.msra.mxu1 %v1646_v18  ;;  %1135 = vmatpush1.bf16.msra.mxu0 %v1648_v20 }
 0x205   : > { %1093 = vmatprep.subr.bf16.mxu1 %v1655_v21  ;;  %1136 = vmatprep.subr.bf16.mxu0 %v1657_v22 }
 0x208   : > { %1094 = vmatpush1.bf16.msra.mxu1 %v1654_v26  ;;  %1137 = vmatpush1.bf16.msra.mxu0 %v1656_v27 }
 0x209   : > { %1095 = vmatprep.subr.bf16.mxu1 %v1663_v28  ;;  %1138 = vmatprep.subr.bf16.mxu0 %v1665_v29 }
 0x20c   : > { %1096 = vmatpush1.bf16.msra.mxu1 %v1662_v34  ;;  %1139 = vmatpush1.bf16.msra.mxu0 %v1664_v35 }
 0x20d   : > { %1097 = vmatprep.subr.bf16.mxu1 %v1671_v36  ;;  %1140 = vmatprep.subr.bf16.mxu0 %v1673_v37 }
 0x210   : > { %1098 = vmatpush1.bf16.msra.mxu1 %v1670_v46  ;;  %1141 = vmatpush1.bf16.msra.mxu0 %v1672_v47 }
 0x211   : > { %1099 = vmatprep.subr.bf16.mxu1 %v1679_v48  ;;  %1142 = vmatprep.subr.bf16.mxu0 %v1681_v49 }
 0x214   : > { %1100 = vmatpush1.bf16.msra.mxu1 %v1678_v54  ;;  %1143 = vmatpush1.bf16.msra.mxu0 %v1680_v55 }
 0x215   : > { %1101 = vmatprep.subr.bf16.mxu1 %v1687_v56  ;;  %1144 = vmatprep.subr.bf16.mxu0 %v1689_v57 }
 0x218   : > { %1102 = vmatpush1.bf16.msra.mxu1 %v1686_v58  ;;  %1145 = vmatpush1.bf16.msra.mxu0 %v1688_v59 }
 0x21b   : > { %1120 = vmatmul.mubr.bf16.vlgmr.msra.gmra.mrb[4].mxu1 %v2439_v4  ;;  %1163 = vmatmul.mubr.bf16.vlgmr.msra.gmra.mrb[8].mxu0 %v2439_v4 }
 0x2ce   : > { %v1035_v3 = vpop.f32.mrb[0].mxu1  ;;  %v1078_v4 = vpop.f32.mrb[4].mxu0 }
 0x2cf   : > { %v1036_v5 = vadd.f32 %v1035_v3, %v644_v62  ;;  %v1079_v6 = vadd.f32 %v1078_v4, %v652_v63  ;;  %v1037_v7 = vpop.f32.mrb[1].mxu1  ;;  %v1080_v8 = vpop.f32.mrb[5].mxu0 }
 0x2d0   : > { %v1038_v41 = vadd.f32 %v1037_v7, %v648_v0  ;;  %v1081_v9 = vadd.f32 %v1080_v8, %v656_v2  ;;  %v1039_v10 = vpop.f32.mrb[2].mxu1  ;;  %v1082_v11 = vpop.f32.mrb[6].mxu0 }
 0x2d1   : > { %v1040_v45 = vadd.f32 %v1039_v10, %v644_v62  ;;  %v1083_v13 = vadd.f32 %v1082_v11, %v652_v63  ;;  %v1041_v15 = vpop.f32.mrb[3].mxu1  ;;  %v1084_v16 = vpop.f32.mrb[7].mxu0  ;;  %v667_v62 = vsub.s32 6, %v2346_v39  ;;  %v663_v63 = vsub.s32 5, %v2346_v39 }
 0x2d2   : > { %v1704_v17 = vpack.c.bf16 %v1038_v41, %v1036_v5  ;;  %v1705_v40 = vpack.c.bf16 %v1081_v9, %v1079_v6  ;;  %v1042_v19 = vadd.f32 %v1041_v15, %v648_v0  ;;  %v1085_v12 = vadd.f32 %v1084_v16, %v656_v2 }
 0x2d3   : > { %v1229_v14 = vmax.f32 %v1036_v5, %v1040_v45  ;;  %v1243_v18 = vmax.f32 %v1079_v6, %v1083_v13  ;;  %v671_v0 = vsub.s32 7, %v2346_v39  ;;  %v660_v2 = vrot.slane %v2519_v60, %v659_v61 }
 0x2d4   : > { %1221 = vst [vmem:[%s2535_s16] sm:$0xff] %v1704_v17  ;;  %1222 = vst [vmem:[%s2535_s16 + $0x8] sm:$0xff] %v1705_v40  ;;  %v1708_v20 = vpack.c.bf16 %v1042_v19, %v1040_v45  ;;  %v1236_v21 = vmax.f32 %v1038_v41, %v1042_v19  ;;  %v1709_v22 = vpack.c.bf16 %v1085_v12, %v1083_v13 }
 0x2d5   : > { %v1250_v23 = vmax.f32 %v1081_v9, %v1085_v12  ;;  %v1230_v24 = vrot.slane %v1229_v14, 4  ;;  %v1244_v1 = vrot.slane %v1243_v18, 4  ;;  %v668_v3 = vrot.slane %v2519_v60, %v667_v62 }
 0x2d6   : > { %1225 = vst [vmem:[%s2535_s16 + $0x20] sm:$0xff] %v1708_v20  ;;  %v1237_v25 = vrot.slane %v1236_v21, 4  ;;  %1226 = vst [vmem:[%s2535_s16 + $0x28] sm:$0xff] %v1709_v22  ;;  %v664_v4 = vrot.slane %v2519_v60, %v663_v63  ;;  %v672_v5 = vrot.slane %v2519_v60, %v671_v0 }
 0x2d7   : > { %v1251_v26 = vrot.slane %v1250_v23, 4  ;;  %v1231_v27 = vmax.f32 %v1229_v14, %v1230_v24  ;;  %v1245_v28 = vmax.f32 %v1243_v18, %v1244_v1 }
 0x2d8   : > { %v1238_v29 = vmax.f32 %v1236_v21, %v1237_v25 }
 0x2d9   : > { %v1252_v32 = vmax.f32 %v1250_v23, %v1251_v26  ;;  %v1232_v33 = vrot.slane %v1231_v27, 2  ;;  %v1246_v34 = vrot.slane %v1245_v28, 2 }
 0x2da   : > { %v1239_v35 = vrot.slane %v1238_v29, 2 }
 0x2db   : > { %v1253_v36 = vrot.slane %v1252_v32, 2  ;;  %v1233_v37 = vmax.f32 %v1231_v27, %v1232_v33  ;;  %v1247_v38 = vmax.f32 %v1245_v28, %v1246_v34 }
 0x2dc   : > { %v1240_v42 = vmax.f32 %v1238_v29, %v1239_v35 }
 0x2dd   : > { %v1254_v44 = vmax.f32 %v1252_v32, %v1253_v36  ;;  %v1234_v46 = vrot.slane %v1233_v37, 1  ;;  %v1248_v47 = vrot.slane %v1247_v38, 1 }
 0x2de   : > { %v1241_v48 = vrot.slane %v1240_v42, 1 }
 0x2df   : > { %v1255_v49 = vrot.slane %v1254_v44, 1  ;;  %v1235_v50 = vmax.f32 %v1233_v37, %v1234_v46  ;;  %v1249_v51 = vmax.f32 %v1247_v38, %v1248_v47 }
 0x2e0   : > { %v1242_v52 = vmax.f32 %v1240_v42, %v1241_v48 }
 0x2e1   : > { %v1256_v54 = vmax.f32 %v1254_v44, %v1255_v49 }
 0x2e2   : > { %v1297_v55 = vcombine.low %v1235_v50, %v1242_v52 }
 0x2e3   : > { %v1298_v56 = vcombine.low %v1249_v51, %v1256_v54 }
 0x2e4   : > { %v2545_v57 = vrot.slane %v1297_v55, %v2542_v53 }
 0x2e5   : > { %v2548_v58 = vrot.slane %v1298_v56, %v2542_v53 }
 0x2e7   : > { %v1329_v59 = vcombine.low %v2545_v57, %v2548_v58 }
 0x2ee   : > { %v1121_v6 = vpop.f32.mrb[4].mxu1  ;;  %v1164_v7 = vpop.f32.mrb[8].mxu0 }
 0x2ef   : > { %v1122_v8 = vadd.f32 %v1121_v6, %v660_v2  ;;  %v1165_v41 = vadd.f32 %v1164_v7, %v668_v3  ;;  %v1123_v9 = vpop.f32.mrb[5].mxu1  ;;  %v1166_v10 = vpop.f32.mrb[9].mxu0 }
 0x2f0   : > { %v1124_v11 = vadd.f32 %v1123_v9, %v664_v4  ;;  %v1167_v45 = vadd.f32 %v1166_v10, %v672_v5  ;;  %v1125_v39 = vpop.f32.mrb[6].mxu1  ;;  %v1168_v13 = vpop.f32.mrb[10].mxu0 }
 0x2f1   : > { %v1126_v15 = vadd.f32 %v1125_v39, %v660_v2  ;;  %v1169_v16 = vadd.f32 %v1168_v13, %v668_v3  ;;  %v1127_v17 = vpop.f32.mrb[7].mxu1  ;;  %v1170_v40 = vpop.f32.mrb[11].mxu0 }
 0x2f2   : > { %v1706_v19 = vpack.c.bf16 %v1124_v11, %v1122_v8  ;;  %v1707_v60 = vpack.c.bf16 %v1167_v45, %v1165_v41  ;;  %v1128_v12 = vadd.f32 %v1127_v17, %v664_v4  ;;  %v1171_v14 = vadd.f32 %v1170_v40, %v672_v5 }
 0x2f3   : > { %v1257_v18 = vmax.f32 %v1122_v8, %v1126_v15  ;;  %v1271_v20 = vmax.f32 %v1165_v41, %v1169_v16 }
 0x2f4   : > { %1223 = vst [vmem:[%s2535_s16 + $0x10] sm:$0xff] %v1706_v19  ;;  %1224 = vst [vmem:[%s2535_s16 + $0x18] sm:$0xff] %v1707_v60  ;;  %v1710_v21 = vpack.c.bf16 %v1128_v12, %v1126_v15  ;;  %v1264_v22 = vmax.f32 %v1124_v11, %v1128_v12  ;;  %v1711_v23 = vpack.c.bf16 %v1171_v14, %v1169_v16 }
 0x2f5   : > { %v1278_v24 = vmax.f32 %v1167_v45, %v1171_v14  ;;  %v1258_v1 = vrot.slane %v1257_v18, 4  ;;  %v1272_v25 = vrot.slane %v1271_v20, 4 }
 0x2f6   : > { %1227 = vst [vmem:[%s2535_s16 + $0x30] sm:$0xff] %v1710_v21  ;;  %v1265_v26 = vrot.slane %v1264_v22, 4  ;;  %1228 = vst [vmem:[%s2535_s16 + $0x38] sm:$0xff] %v1711_v23 }
 0x2f7   : > { %v1279_v27 = vrot.slane %v1278_v24, 4  ;;  %v1259_v28 = vmax.f32 %v1257_v18, %v1258_v1  ;;  %v1273_v29 = vmax.f32 %v1271_v20, %v1272_v25 }
 0x2f8   : > { %1967 = shalt.err (!%p1964_p6)
}
 0x2f9   : > { %s1968_s24 = scalar_lea.hbm %s2567_s2, 1024  ;;  %s1972_s22 = scalar_lea.hbm %s2639_s7, 2048 }
 0x2fa   : > { %p1969_p7 = scmp.ne.s32.totalorder %s2567_s2, %s1968_s24  ;;  %p1973_p0 = scmp.lt.u32.totalorder %s2567_s2, %s2639_s7 }
 0x2fb   : > { %p1974_p2 = scmp.lt.u32.totalorder %s1972_s22, %s1968_s24  ;;  %p1976_p1 = scmp.lt.u32.totalorder %s1968_s24, %s2567_s2 }
 0x2fc   : > { %p1970_p9 = pnand %p1969_p7, %p2662_p4 }
 0x2fd   : > { %p1975_p13 = por %p1974_p2, %p1973_p0 }
 0x2fe   : > { %p1971_p12 = pneg %p1970_p9 }
 0x2ff   : > { %p1977_p8 = por %p1976_p1, %p1975_p13 }
 0x301   : > { %p1978_p10 = pnand %p1977_p8, %p1971_p12 }
 0x303   : > { %1981 = shalt.err (!%p1978_p10)
}
 0x304   : > { %s2057_s16 = smov 512   ;;  %s2058_s23 = smov 32   ;;  %v1266_v30 = vmax.f32 %v1264_v22, %v1265_v26  ;;  %v1280_v31 = vmax.f32 %v1278_v24, %v1279_v27  ;;  %v1260_v32 = vrot.slane %v1259_v28, 2  ;;  %v1274_v33 = vrot.slane %v1273_v29, 2 }
 0x305   : > { %1746 = dma.vmem_to_hbm [thread:$0]  (%p2662_p4), %s2562_s18, 1024, %s2567_s2, %s2575_s30, %s2057_s16, %s2057_s16, %s2058_s23   ;;  %v1337_v62 = vrot.slane %v1329_v59, %v2542_v53 }
 0x306   : > { %v1267_v34 = vrot.slane %v1266_v30, 2  ;;  %v1281_v35 = vrot.slane %v1280_v31, 2  ;;  %v1261_v36 = vmax.f32 %v1259_v28, %v1260_v32  ;;  %v1275_v37 = vmax.f32 %v1273_v29, %v1274_v33  ;;  %s1618_s15 = sshll.u32 %s2277_s19, 3 }
 0x307   : > { %s423_s12 = scalar_lea.vmem %s2640_s8, %s1618_s15 }
 0x308   : > { %v1268_v38 = vmax.f32 %v1266_v30, %v1267_v34  ;;  %v1282_v42 = vmax.f32 %v1280_v31, %v1281_v35  ;;  %v1262_v43 = vrot.slane %v1261_v36, 1  ;;  %v1276_v44 = vrot.slane %v1275_v37, 1 }
 0x30a   : > { %v1269_v46 = vrot.slane %v1268_v38, 1  ;;  %v1283_v47 = vrot.slane %v1282_v42, 1  ;;  %v1263_v48 = vmax.f32 %v1261_v36, %v1262_v43  ;;  %v1277_v49 = vmax.f32 %v1275_v37, %v1276_v44 }
 0x30c   : > { %v1270_v50 = vmax.f32 %v1268_v38, %v1269_v46  ;;  %v1284_v51 = vmax.f32 %v1282_v42, %v1283_v47 }
 0x30e   : > { %v1299_v52 = vcombine.low %v1263_v48, %v1270_v50  ;;  %v1300_v54 = vcombine.low %v1277_v49, %v1284_v51 }
 0x310   : > { %v1321_v55 = vrot.slane %v1299_v52, %v2542_v53  ;;  %v1328_v56 = vrot.slane %v1300_v54, %v2542_v53 }
 0x312   : > { %v1330_v61 = vcombine.low %v1321_v55, %v1328_v56 }
 0x314   : > { %v1344_v63 = vrot.slane %v1330_v61, %v2542_v53 }
 0x316   : > { %v1345_v0 = vcombine.low %v1337_v62, %v1344_v63 }
 0x318   : > { %1347 = vst [vmem:[%s423_s12] sm:$0xff] %v1345_v0 }
 0x319 PF: > { %p1773_p4 = scmp.ge.s32.totalorder %s2044_s10, 2  ;;  %s1457_s19 = sand.u32 1, %s2024_s27  }
 0x31a   : > { %p2663_p11 = scmp.ne.s32.totalorder %s2653_s17, 0  ;;  %s1458_s2 = scalar_lea.sflag [#allocation4], %s1457_s19 }
 0x31c   : > { %p1762_p3 = pnand %p1773_p4, %p2663_p11 }
 0x31e   : > { %2019 = dma.done.wait (!%p1762_p3), %s1458_s2, 1024  }
 0x31f   : > { %2021 = vsyncadd (!%p1762_p3), %s1458_s2, 4294966272  ;;  %s25_s10 = sadd.s32 1, %s2044_s10   ;;  %s2664_s30 = sld [smem:[#allocation15_spill]] }
 0x320   : > { %p22_p5 = scmp.ge.s32.totalorder %s25_s10, 4   ;;  %s2665_s29 = sld [smem:[#allocation18_spill]] }
 0x321   : > { %s2666_s20 = sld [smem:[#allocation16_spill]]  ;;  %s2667_s9 = sld [smem:[#allocation17_spill]] }
 0x322   : > { %s2668_s27 = smov %s2028_s28  ;;  %24 = sbr.rel (!%p22_p5) target bundleno = 9 (0x9), region = 120 }
 0x325   : > { %s2669_s28 = smov %s2664_s30 }
 0x327   : > { %s2670_s30 = smov %s2666_s20 }
 0x329   :  { %1474 = vsyncpa [#allocation3], 1 }
 0x32a   :  { %1476 = vsyncpa [#allocation3 + $0x1], 1 }
 0x32b   :  { %1477 = vsyncpa [#allocation6], 1 }
 0x32c   :  { %1478 = vsyncpa [#allocation9], 1 }
 0x32d   :  { %1479 = vsyncpa [#allocation4], 1 }
 0x32e   :  { %1481 = vsyncpa [#allocation4 + $0x1], 1 }

// kernel: pointnet_cls_forward.3
= control target key start
LH: loop header
LB: loop body
LE: loop exit
PB: predicated region body
PF: predicated region fallthrough
CT: control target
= control target key end

     0   :  { %v3524_v36 = vmov 1983009808   ;;  %v35_v38 = vlaneseq  ;;  %s4724_s0 = inlined_call_operand.vmem [shape: f32[2,1024], index: 0, kind: input, shape index: {}]   ;;  %s4725_s1 = inlined_call_operand.vmem [shape: bf16[1024,512], index: 1, kind: input, shape index: {}]   ;;  %s4726_s2 = inlined_call_operand.vmem [shape: f32[1,512], index: 2, kind: input, shape index: {}]   ;;  %s4727_s3 = inlined_call_operand.vmem [shape: bf16[512,256], index: 3, kind: input, shape index: {}]   ;;  %s4728_s4 = inlined_call_operand.vmem [shape: f32[1,256], index: 4, kind: input, shape index: {}]   ;;  %s4729_s5 = inlined_call_operand.vmem [shape: f32[256,2], index: 5, kind: input, shape index: {}]   ;;  %s4730_s6 = inlined_call_operand.vmem [shape: f32[1,2], index: 6, kind: input, shape index: {}]   ;;  %s4731_s7 = inlined_call_operand.hbm [shape: f32[2,2], index: 7, kind: output, shape index: {}]  }
   0x1   :  { %v3014_v0 = vld [vmem:[%s4725_s1 + $0x4] ss:$16 sps:$4 sm:$0xff]   ;;  %v3018_v2 = vld [vmem:[%s4725_s1] ss:$16 sps:$4 sm:$0xff]   ;;  %v33_v37 = vunpack.c.l.s4 %v3524_v36 }
   0x2   :  { %v3016_v1 = vld [vmem:[%s4725_s1 + $0x204] ss:$16 sps:$4 sm:$0xff]   ;;  %1639 = vmatprep.subr.bf16.mxu1 %v3014_v0  ;;  %v3019_v3 = vld [vmem:[%s4725_s1 + $0x200] ss:$16 sps:$4 sm:$0xff]   ;;  %v3683_v43 = vshrl.u32 %v35_v38, 7 }
   0x3   :  { %1680 = vmatprep.subr.bf16.mxu0 %v3016_v1  ;;  %v3020_v4 = vld [vmem:[%s4725_s1 + $0x24] ss:$16 sps:$4 sm:$0xff]   ;;  %1640 = vmatpush1.bf16.msra.mxu1 %v3018_v2  ;;  %v3024_v6 = vld [vmem:[%s4725_s1 + $0x20] ss:$16 sps:$4 sm:$0xff]   ;;  %v34_v42 = vunpack.c.0.s8 %v33_v37  ;;  %v3146_v37 = vld [vmem:[%s4725_s1 + $0xac] ss:$16 sps:$4 sm:$0xff]  }
   0x4   :  { %1681 = vmatpush1.bf16.msra.mxu0 %v3019_v3  ;;  %v3022_v5 = vld [vmem:[%s4725_s1 + $0x224] ss:$16 sps:$4 sm:$0xff]   ;;  %1641 = vmatprep.subr.bf16.mxu1 %v3020_v4  ;;  %v3025_v7 = vld [vmem:[%s4725_s1 + $0x220] ss:$16 sps:$4 sm:$0xff]  }
   0x5   :  { %1682 = vmatprep.subr.bf16.mxu0 %v3022_v5  ;;  %v3026_v8 = vld [vmem:[%s4725_s1 + $0x44] ss:$16 sps:$4 sm:$0xff]   ;;  %v3030_v10 = vld [vmem:[%s4725_s1 + $0x40] ss:$16 sps:$4 sm:$0xff]   ;;  %v3701_v49 = vsub.s32 %v34_v42, %v3683_v43  ;;  %v3858_v42 = vld [vmem:[%s4724_s0 + $0x8] sm:$0xff] }
   0x6   :  { %v3028_v9 = vld [vmem:[%s4725_s1 + $0x244] ss:$16 sps:$4 sm:$0xff]   ;;  %v3031_v11 = vld [vmem:[%s4725_s1 + $0x240] ss:$16 sps:$4 sm:$0xff]  }
   0x7   :  { %1642 = vmatpush1.bf16.msra.mxu1 %v3024_v6  ;;  %v3032_v12 = vld [vmem:[%s4725_s1 + $0x64] ss:$16 sps:$4 sm:$0xff]   ;;  %v3036_v14 = vld [vmem:[%s4725_s1 + $0x60] ss:$16 sps:$4 sm:$0xff]  }
   0x8   :  { %1683 = vmatpush1.bf16.msra.mxu0 %v3025_v7  ;;  %1643 = vmatprep.subr.bf16.mxu1 %v3026_v8  ;;  %v3034_v13 = vld [vmem:[%s4725_s1 + $0x264] ss:$16 sps:$4 sm:$0xff]   ;;  %v3037_v15 = vld [vmem:[%s4725_s1 + $0x260] ss:$16 sps:$4 sm:$0xff]  }
   0x9   :  { %1684 = vmatprep.subr.bf16.mxu0 %v3028_v9  ;;  %v3038_v16 = vld [vmem:[%s4725_s1 + $0x84] ss:$16 sps:$4 sm:$0xff]   ;;  %v3042_v18 = vld [vmem:[%s4725_s1 + $0x80] ss:$16 sps:$4 sm:$0xff]  }
   0xa   :  { %v3040_v17 = vld [vmem:[%s4725_s1 + $0x284] ss:$16 sps:$4 sm:$0xff]   ;;  %v3043_v19 = vld [vmem:[%s4725_s1 + $0x280] ss:$16 sps:$4 sm:$0xff]  }
   0xb   :  { %1644 = vmatpush1.bf16.msra.mxu1 %v3030_v10  ;;  %v3044_v20 = vld [vmem:[%s4725_s1 + $0xa4] ss:$16 sps:$4 sm:$0xff]   ;;  %v3048_v22 = vld [vmem:[%s4725_s1 + $0xa0] ss:$16 sps:$4 sm:$0xff]  }
   0xc   :  { %1685 = vmatpush1.bf16.msra.mxu0 %v3031_v11  ;;  %1645 = vmatprep.subr.bf16.mxu1 %v3032_v12  ;;  %v3046_v21 = vld [vmem:[%s4725_s1 + $0x2a4] ss:$16 sps:$4 sm:$0xff]   ;;  %v3049_v23 = vld [vmem:[%s4725_s1 + $0x2a0] ss:$16 sps:$4 sm:$0xff]  }
   0xd   :  { %1686 = vmatprep.subr.bf16.mxu0 %v3034_v13  ;;  %v3050_v24 = vld [vmem:[%s4725_s1 + $0xc4] ss:$16 sps:$4 sm:$0xff]   ;;  %v3054_v26 = vld [vmem:[%s4725_s1 + $0xc0] ss:$16 sps:$4 sm:$0xff]  }
   0xe   :  { %v3052_v25 = vld [vmem:[%s4725_s1 + $0x2c4] ss:$16 sps:$4 sm:$0xff]   ;;  %v3055_v27 = vld [vmem:[%s4725_s1 + $0x2c0] ss:$16 sps:$4 sm:$0xff]  }
   0xf   :  { %1646 = vmatpush1.bf16.msra.mxu1 %v3036_v14  ;;  %v3056_v28 = vld [vmem:[%s4725_s1 + $0xe4] ss:$16 sps:$4 sm:$0xff]   ;;  %v3060_v30 = vld [vmem:[%s4725_s1 + $0xe0] ss:$16 sps:$4 sm:$0xff]  }
  0x10   :  { %1687 = vmatpush1.bf16.msra.mxu0 %v3037_v15  ;;  %1647 = vmatprep.subr.bf16.mxu1 %v3038_v16  ;;  %v3058_v29 = vld [vmem:[%s4725_s1 + $0x2e4] ss:$16 sps:$4 sm:$0xff]   ;;  %v3061_v31 = vld [vmem:[%s4725_s1 + $0x2e0] ss:$16 sps:$4 sm:$0xff]   ;;  %v3116_v15 = vld [vmem:[%s4725_s1 + $0xc] ss:$16 sps:$4 sm:$0xff]  }
  0x11   :  { %1688 = vmatprep.subr.bf16.mxu0 %v3040_v17  ;;  %v3062_v32 = vld [vmem:[%s4725_s1 + $0x104] ss:$16 sps:$4 sm:$0xff]   ;;  %v3066_v34 = vld [vmem:[%s4725_s1 + $0x100] ss:$16 sps:$4 sm:$0xff]  }
  0x12   :  { %v3064_v33 = vld [vmem:[%s4725_s1 + $0x304] ss:$16 sps:$4 sm:$0xff]   ;;  %v3067_v35 = vld [vmem:[%s4725_s1 + $0x300] ss:$16 sps:$4 sm:$0xff]  }
  0x13   :  { %1648 = vmatpush1.bf16.msra.mxu1 %v3042_v18  ;;  %v3068_v39 = vld [vmem:[%s4725_s1 + $0x124] ss:$16 sps:$4 sm:$0xff]   ;;  %v3072_v41 = vld [vmem:[%s4725_s1 + $0x120] ss:$16 sps:$4 sm:$0xff]  }
  0x14   :  { %1689 = vmatpush1.bf16.msra.mxu0 %v3043_v19  ;;  %1649 = vmatprep.subr.bf16.mxu1 %v3044_v20  ;;  %v3070_v40 = vld [vmem:[%s4725_s1 + $0x324] ss:$16 sps:$4 sm:$0xff]   ;;  %v3073_v44 = vld [vmem:[%s4725_s1 + $0x320] ss:$16 sps:$4 sm:$0xff]   ;;  %v3114_v19 = vld [vmem:[%s4725_s1 + $0x8] ss:$16 sps:$4 sm:$0xff]  }
  0x15   :  { %1690 = vmatprep.subr.bf16.mxu0 %v3046_v21  ;;  %v3074_v45 = vld [vmem:[%s4725_s1 + $0x144] ss:$16 sps:$4 sm:$0xff]   ;;  %v3078_v47 = vld [vmem:[%s4725_s1 + $0x140] ss:$16 sps:$4 sm:$0xff]   ;;  %v3122_v21 = vld [vmem:[%s4725_s1 + $0x2c] ss:$16 sps:$4 sm:$0xff]  }
  0x16   :  { %v3076_v46 = vld [vmem:[%s4725_s1 + $0x344] ss:$16 sps:$4 sm:$0xff]   ;;  %v3079_v48 = vld [vmem:[%s4725_s1 + $0x340] ss:$16 sps:$4 sm:$0xff]  }
  0x17   :  { %1650 = vmatpush1.bf16.msra.mxu1 %v3048_v22  ;;  %v3080_v50 = vld [vmem:[%s4725_s1 + $0x164] ss:$16 sps:$4 sm:$0xff]   ;;  %v3084_v53 = vld [vmem:[%s4725_s1 + $0x160] ss:$16 sps:$4 sm:$0xff]  }
  0x18   :  { %1691 = vmatpush1.bf16.msra.mxu0 %v3049_v23  ;;  %1651 = vmatprep.subr.bf16.mxu1 %v3050_v24  ;;  %v3082_v51 = vld [vmem:[%s4725_s1 + $0x364] ss:$16 sps:$4 sm:$0xff]   ;;  %v3085_v56 = vld [vmem:[%s4725_s1 + $0x360] ss:$16 sps:$4 sm:$0xff]   ;;  %v3120_v23 = vld [vmem:[%s4725_s1 + $0x28] ss:$16 sps:$4 sm:$0xff]  }
  0x19   :  { %1692 = vmatprep.subr.bf16.mxu0 %v3052_v25  ;;  %v27_v52 = vld [vmem:[%s4724_s0] sm:$0xff]  ;;  %v3128_v25 = vld [vmem:[%s4725_s1 + $0x4c] ss:$16 sps:$4 sm:$0xff]  }
  0x1a   :  { %v38_v54 = vrot.slane %v27_v52, %v3701_v49  ;;  %v31_v55 = vcombine.high %v27_v52, %v27_v52  ;;  %v3086_v57 = vld [vmem:[%s4725_s1 + $0x184] ss:$16 sps:$4 sm:$0xff]   ;;  %v3090_v61 = vld [vmem:[%s4725_s1 + $0x180] ss:$16 sps:$4 sm:$0xff]  }
  0x1b   :  { %1652 = vmatpush1.bf16.msra.mxu1 %v3054_v26  ;;  %v3088_v58 = vld [vmem:[%s4725_s1 + $0x384] ss:$16 sps:$4 sm:$0xff]   ;;  %v3091_v0 = vld [vmem:[%s4725_s1 + $0x380] ss:$16 sps:$4 sm:$0xff]  }
  0x1c   :  { %1693 = vmatpush1.bf16.msra.mxu0 %v3055_v27  ;;  %1653 = vmatprep.subr.bf16.mxu1 %v3056_v28  ;;  %v46_v59 = vcombine.high %v38_v54, %v38_v54  ;;  %v45_v60 = vrot.slane %v31_v55, %v3701_v49  ;;  %v3092_v1 = vld [vmem:[%s4725_s1 + $0x1a4] ss:$16 sps:$4 sm:$0xff]   ;;  %v3096_v4 = vld [vmem:[%s4725_s1 + $0x1a0] ss:$16 sps:$4 sm:$0xff]   ;;  %v3777_v16 = vpack.c.bf16 %v38_v54, %v38_v54  ;;  %v3126_v27 = vld [vmem:[%s4725_s1 + $0x48] ss:$16 sps:$4 sm:$0xff]  }
  0x1d   :  { %1694 = vmatprep.subr.bf16.mxu0 %v3058_v29  ;;  %v3094_v2 = vld [vmem:[%s4725_s1 + $0x3a4] ss:$16 sps:$4 sm:$0xff]   ;;  %v3097_v5 = vld [vmem:[%s4725_s1 + $0x3a0] ss:$16 sps:$4 sm:$0xff]   ;;  %v3134_v29 = vld [vmem:[%s4725_s1 + $0x6c] ss:$16 sps:$4 sm:$0xff]  }
  0x1e   :  { %v74_v62 = vpack.c.bf16 %v46_v59, %v46_v59  ;;  %v47_v63 = vcombine.high %v45_v60, %v45_v60  ;;  %v3098_v6 = vld [vmem:[%s4725_s1 + $0x1c4] ss:$16 sps:$4 sm:$0xff]   ;;  %v3102_v8 = vld [vmem:[%s4725_s1 + $0x1c0] ss:$16 sps:$4 sm:$0xff]   ;;  %v3782_v18 = vpack.c.bf16 %v45_v60, %v45_v60  ;;  %v3164_v55 = vld [vmem:[%s4725_s1 + $0x10c] ss:$16 sps:$4 sm:$0xff]  }
  0x1f   :  { %1654 = vmatpush1.bf16.msra.mxu1 %v3060_v30  ;;  %v3100_v7 = vld [vmem:[%s4725_s1 + $0x3c4] ss:$16 sps:$4 sm:$0xff]   ;;  %v3103_v9 = vld [vmem:[%s4725_s1 + $0x3c0] ss:$16 sps:$4 sm:$0xff]   ;;  %v3170_v59 = vld [vmem:[%s4725_s1 + $0x12c] ss:$16 sps:$4 sm:$0xff]  }
  0x20   :  { %1695 = vmatpush1.bf16.msra.mxu0 %v3061_v31  ;;  %1655 = vmatprep.subr.bf16.mxu1 %v3062_v32  ;;  %v3738_v3 = vpack.c.bf16 %v47_v63, %v47_v63  ;;  %v3104_v10 = vld [vmem:[%s4725_s1 + $0x1e4] ss:$16 sps:$4 sm:$0xff]   ;;  %v3108_v12 = vld [vmem:[%s4725_s1 + $0x1e0] ss:$16 sps:$4 sm:$0xff]   ;;  %v3132_v31 = vld [vmem:[%s4725_s1 + $0x68] ss:$16 sps:$4 sm:$0xff]  }
  0x21   :  { %1696 = vmatprep.subr.bf16.mxu0 %v3064_v33  ;;  %1671 = vmatprep.mubr.bf16.mxu1 %v74_v62  ;;  %v3106_v11 = vld [vmem:[%s4725_s1 + $0x3e4] ss:$16 sps:$4 sm:$0xff]   ;;  %v3109_v13 = vld [vmem:[%s4725_s1 + $0x3e0] ss:$16 sps:$4 sm:$0xff]   ;;  %v3140_v33 = vld [vmem:[%s4725_s1 + $0x8c] ss:$16 sps:$4 sm:$0xff]  }
  0x22   :  { %1712 = vmatprep.mubr.bf16.mxu0 %v3738_v3  ;;  %v3113_v14 = vld [vmem:[%s4725_s1 + $0x404] ss:$16 sps:$4 sm:$0xff]   ;;  %v3111_v17 = vld [vmem:[%s4725_s1 + $0x400] ss:$16 sps:$4 sm:$0xff]   ;;  %v3176_v63 = vld [vmem:[%s4725_s1 + $0x14c] ss:$16 sps:$4 sm:$0xff]  }
  0x23   :  { %1656 = vmatpush1.bf16.msra.mxu1 %v3066_v34  ;;  %v3119_v20 = vld [vmem:[%s4725_s1 + $0x424] ss:$16 sps:$4 sm:$0xff]   ;;  %v3117_v22 = vld [vmem:[%s4725_s1 + $0x420] ss:$16 sps:$4 sm:$0xff]  }
  0x24   :  { %1697 = vmatpush1.bf16.msra.mxu0 %v3067_v35  ;;  %1657 = vmatprep.subr.bf16.mxu1 %v3068_v39  ;;  %v3125_v24 = vld [vmem:[%s4725_s1 + $0x444] ss:$16 sps:$4 sm:$0xff]   ;;  %v3123_v26 = vld [vmem:[%s4725_s1 + $0x440] ss:$16 sps:$4 sm:$0xff]   ;;  %v3138_v35 = vld [vmem:[%s4725_s1 + $0x88] ss:$16 sps:$4 sm:$0xff]  }
  0x25   :  { %1698 = vmatprep.subr.bf16.mxu0 %v3070_v40  ;;  %v3131_v28 = vld [vmem:[%s4725_s1 + $0x464] ss:$16 sps:$4 sm:$0xff]   ;;  %v3129_v30 = vld [vmem:[%s4725_s1 + $0x460] ss:$16 sps:$4 sm:$0xff]   ;;  %v3144_v39 = vld [vmem:[%s4725_s1 + $0xa8] ss:$16 sps:$4 sm:$0xff]  }
  0x26   :  { %v3137_v32 = vld [vmem:[%s4725_s1 + $0x484] ss:$16 sps:$4 sm:$0xff]   ;;  %v3135_v34 = vld [vmem:[%s4725_s1 + $0x480] ss:$16 sps:$4 sm:$0xff]  }
  0x27   :  { %1658 = vmatpush1.bf16.msra.mxu1 %v3072_v41  ;;  %v3143_v36 = vld [vmem:[%s4725_s1 + $0x4a4] ss:$16 sps:$4 sm:$0xff]   ;;  %v3141_v38 = vld [vmem:[%s4725_s1 + $0x4a0] ss:$16 sps:$4 sm:$0xff]   ;;  %v3152_v41 = vld [vmem:[%s4725_s1 + $0xcc] ss:$16 sps:$4 sm:$0xff]  }
  0x28   :  { %1699 = vmatpush1.bf16.msra.mxu0 %v3073_v44  ;;  %1659 = vmatprep.subr.bf16.mxu1 %v3074_v45  ;;  %v3149_v40 = vld [vmem:[%s4725_s1 + $0x4c4] ss:$16 sps:$4 sm:$0xff]   ;;  %v3862_v44 = vrot.slane %v3858_v42, %v3701_v49  ;;  %v3147_v45 = vld [vmem:[%s4725_s1 + $0x4c0] ss:$16 sps:$4 sm:$0xff]  }
  0x29   :  { %1700 = vmatprep.subr.bf16.mxu0 %v3076_v46  ;;  %v3150_v46 = vld [vmem:[%s4725_s1 + $0xc8] ss:$16 sps:$4 sm:$0xff]   ;;  %v3153_v52 = vld [vmem:[%s4725_s1 + $0x4e0] ss:$16 sps:$4 sm:$0xff]   ;;  %v3161_v54 = vld [vmem:[%s4725_s1 + $0x504] ss:$16 sps:$4 sm:$0xff]  }
  0x2a   :  { %v3165_v60 = vld [vmem:[%s4725_s1 + $0x520] ss:$16 sps:$4 sm:$0xff]  }
  0x2b   :  { %1660 = vmatpush1.bf16.msra.mxu1 %v3078_v47  ;;  %v63_v47 = vcombine.high %v3862_v44, %v3862_v44 }
  0x2c   :  { %1701 = vmatpush1.bf16.msra.mxu0 %v3079_v48  ;;  %1661 = vmatprep.subr.bf16.mxu1 %v3080_v50  ;;  %v3155_v48 = vld [vmem:[%s4725_s1 + $0x4e4] ss:$16 sps:$4 sm:$0xff]   ;;  %v3158_v50 = vld [vmem:[%s4725_s1 + $0xec] ss:$16 sps:$4 sm:$0xff]  }
  0x2d   :  { %1702 = vmatprep.subr.bf16.mxu0 %v3082_v51  ;;  %v3878_v51 = vpack.c.bf16 %v63_v47, %v63_v47  ;;  %v3234_v47 = vld [vmem:[%s4725_s1 + $0x288] ss:$16 sps:$4 sm:$0xff]  }
  0x2f   :  { %1662 = vmatpush1.bf16.msra.mxu1 %v3084_v53  ;;  %v3156_v53 = vld [vmem:[%s4725_s1 + $0xe8] ss:$16 sps:$4 sm:$0xff]  }
  0x30   :  { %1703 = vmatpush1.bf16.msra.mxu0 %v3085_v56  ;;  %1663 = vmatprep.subr.bf16.mxu1 %v3086_v57  ;;  %v3159_v56 = vld [vmem:[%s4725_s1 + $0x500] ss:$16 sps:$4 sm:$0xff]   ;;  %v3162_v57 = vld [vmem:[%s4725_s1 + $0x108] ss:$16 sps:$4 sm:$0xff]  }
  0x31   :  { %1704 = vmatprep.subr.bf16.mxu0 %v3088_v58  ;;  %v3167_v58 = vld [vmem:[%s4725_s1 + $0x524] ss:$16 sps:$4 sm:$0xff]  }
  0x33   :  { %1664 = vmatpush1.bf16.msra.mxu1 %v3090_v61  ;;  %v3168_v61 = vld [vmem:[%s4725_s1 + $0x128] ss:$16 sps:$4 sm:$0xff]  }
  0x34   :  { %1705 = vmatpush1.bf16.msra.mxu0 %v3091_v0  ;;  %1665 = vmatprep.subr.bf16.mxu1 %v3092_v1  ;;  %v3171_v0 = vld [vmem:[%s4725_s1 + $0x540] ss:$16 sps:$4 sm:$0xff]   ;;  %v3174_v1 = vld [vmem:[%s4725_s1 + $0x148] ss:$16 sps:$4 sm:$0xff]  }
  0x35   :  { %1706 = vmatprep.subr.bf16.mxu0 %v3094_v2  ;;  %v3179_v2 = vld [vmem:[%s4725_s1 + $0x564] ss:$16 sps:$4 sm:$0xff]  }
  0x37   :  { %1666 = vmatpush1.bf16.msra.mxu1 %v3096_v4  ;;  %v3182_v4 = vld [vmem:[%s4725_s1 + $0x16c] ss:$16 sps:$4 sm:$0xff]  }
  0x38   :  { %1707 = vmatpush1.bf16.msra.mxu0 %v3097_v5  ;;  %1667 = vmatprep.subr.bf16.mxu1 %v3098_v6  ;;  %v3177_v5 = vld [vmem:[%s4725_s1 + $0x560] ss:$16 sps:$4 sm:$0xff]   ;;  %v3180_v6 = vld [vmem:[%s4725_s1 + $0x168] ss:$16 sps:$4 sm:$0xff]  }
  0x39   :  { %1708 = vmatprep.subr.bf16.mxu0 %v3100_v7  ;;  %v3185_v7 = vld [vmem:[%s4725_s1 + $0x584] ss:$16 sps:$4 sm:$0xff]  }
  0x3b   :  { %1668 = vmatpush1.bf16.msra.mxu1 %v3102_v8  ;;  %v3188_v8 = vld [vmem:[%s4725_s1 + $0x18c] ss:$16 sps:$4 sm:$0xff]  }
  0x3c   :  { %1709 = vmatpush1.bf16.msra.mxu0 %v3103_v9  ;;  %1669 = vmatprep.subr.bf16.mxu1 %v3104_v10  ;;  %v3183_v9 = vld [vmem:[%s4725_s1 + $0x580] ss:$16 sps:$4 sm:$0xff]   ;;  %v3186_v10 = vld [vmem:[%s4725_s1 + $0x188] ss:$16 sps:$4 sm:$0xff]  }
  0x3d   :  { %1710 = vmatprep.subr.bf16.mxu0 %v3106_v11  ;;  %v3191_v11 = vld [vmem:[%s4725_s1 + $0x5a4] ss:$16 sps:$4 sm:$0xff]  }
  0x3f   :  { %1670 = vmatpush1.bf16.msra.mxu1 %v3108_v12  ;;  %v3194_v12 = vld [vmem:[%s4725_s1 + $0x1ac] ss:$16 sps:$4 sm:$0xff]  }
  0x40   :  { %1711 = vmatpush1.bf16.msra.mxu0 %v3109_v13  ;;  %1803 = vmatprep.subr.bf16.mxu1 %v3116_v15  ;;  %v3189_v13 = vld [vmem:[%s4725_s1 + $0x5a0] ss:$16 sps:$4 sm:$0xff]   ;;  %v3197_v15 = vld [vmem:[%s4725_s1 + $0x5c4] ss:$16 sps:$4 sm:$0xff]  }
  0x41   :  { %1721 = vmatprep.subr.bf16.mxu0 %v3113_v14  ;;  %v3192_v14 = vld [vmem:[%s4725_s1 + $0x1a8] ss:$16 sps:$4 sm:$0xff]  }
  0x42   :  { %1672 = vmatmul.mubr.bf16.vlgmr.msra.gmra.mrb[0].mxu1 %v3777_v16 }
  0x43   :  { %1713 = vmatmul.mubr.bf16.vlgmr.msra.gmra.mrb[0].mxu0 %v3782_v18  ;;  %1804 = vmatpush1.bf16.msra.mxu1 %v3114_v19  ;;  %v48_v19 = vcombine.high %v3858_v42, %v3858_v42  ;;  %v3228_v42 = vld [vmem:[%s4725_s1 + $0x268] ss:$16 sps:$4 sm:$0xff]  }
  0x44   :  { %1722 = vmatpush1.bf16.msra.mxu0 %v3111_v17  ;;  %1805 = vmatprep.subr.bf16.mxu1 %v3122_v21  ;;  %v3200_v17 = vld [vmem:[%s4725_s1 + $0x1cc] ss:$16 sps:$4 sm:$0xff]   ;;  %v3198_v21 = vld [vmem:[%s4725_s1 + $0x1c8] ss:$16 sps:$4 sm:$0xff]  }
  0x45   :  { %1723 = vmatprep.subr.bf16.mxu0 %v3119_v20  ;;  %1835 = vmatprep.mubr.bf16.mxu1 %v74_v62  ;;  %v3173_v62 = vld [vmem:[%s4725_s1 + $0x544] ss:$16 sps:$4 sm:$0xff]   ;;  %v3195_v20 = vld [vmem:[%s4725_s1 + $0x5c0] ss:$16 sps:$4 sm:$0xff]  }
  0x46   :  { %1753 = vmatprep.mubr.bf16.mxu0 %v3878_v51 }
  0x47   :  { %1806 = vmatpush1.bf16.msra.mxu1 %v3120_v23  ;;  %v3206_v23 = vld [vmem:[%s4725_s1 + $0x1ec] ss:$16 sps:$4 sm:$0xff]  }
  0x48   :  { %1724 = vmatpush1.bf16.msra.mxu0 %v3117_v22  ;;  %1807 = vmatprep.subr.bf16.mxu1 %v3128_v25  ;;  %v3203_v22 = vld [vmem:[%s4725_s1 + $0x5e4] ss:$16 sps:$4 sm:$0xff]   ;;  %v3201_v25 = vld [vmem:[%s4725_s1 + $0x5e0] ss:$16 sps:$4 sm:$0xff]  }
  0x49   :  { %1725 = vmatprep.subr.bf16.mxu0 %v3125_v24  ;;  %v3980_v24 = vrot.slane %v48_v19, %v3701_v49  ;;  %v3212_v49 = vld [vmem:[%s4725_s1 + $0x20c] ss:$16 sps:$4 sm:$0xff]   ;;  %v3279_v19 = vld [vmem:[%s4725_s1 + $0x780] ss:$16 sps:$4 sm:$0xff]  }
  0x4b   :  { %1808 = vmatpush1.bf16.msra.mxu1 %v3126_v27  ;;  %v3209_v27 = vld [vmem:[%s4725_s1 + $0x604] ss:$16 sps:$4 sm:$0xff]  }
  0x4c   :  { %1726 = vmatpush1.bf16.msra.mxu0 %v3123_v26  ;;  %1809 = vmatprep.subr.bf16.mxu1 %v3134_v29  ;;  %v3204_v26 = vld [vmem:[%s4725_s1 + $0x1e8] ss:$16 sps:$4 sm:$0xff]   ;;  %v3998_v29 = vpack.c.bf16 %v3862_v44, %v3862_v44  ;;  %v3233_v44 = vld [vmem:[%s4725_s1 + $0x684] ss:$16 sps:$4 sm:$0xff]  }
  0x4d   :  { %1727 = vmatprep.subr.bf16.mxu0 %v3131_v28  ;;  %v64_v28 = vcombine.high %v3980_v24, %v3980_v24 }
  0x4f   :  { %1810 = vmatpush1.bf16.msra.mxu1 %v3132_v31  ;;  %v3210_v31 = vld [vmem:[%s4725_s1 + $0x208] ss:$16 sps:$4 sm:$0xff]  }
  0x50   :  { %1728 = vmatpush1.bf16.msra.mxu0 %v3129_v30  ;;  %1811 = vmatprep.subr.bf16.mxu1 %v3140_v33  ;;  %v3207_v30 = vld [vmem:[%s4725_s1 + $0x600] ss:$16 sps:$4 sm:$0xff]   ;;  %v3218_v33 = vld [vmem:[%s4725_s1 + $0x22c] ss:$16 sps:$4 sm:$0xff]  }
  0x51   :  { %1729 = vmatprep.subr.bf16.mxu0 %v3137_v32  ;;  %v3215_v32 = vld [vmem:[%s4725_s1 + $0x624] ss:$16 sps:$4 sm:$0xff]  }
  0x53   :  { %1812 = vmatpush1.bf16.msra.mxu1 %v3138_v35  ;;  %v3213_v35 = vld [vmem:[%s4725_s1 + $0x620] ss:$16 sps:$4 sm:$0xff]  }
  0x54   :  { %1730 = vmatpush1.bf16.msra.mxu0 %v3135_v34  ;;  %1813 = vmatprep.subr.bf16.mxu1 %v3146_v37  ;;  %v4012_v34 = vpack.c.bf16 %v64_v28, %v64_v28  ;;  %v3221_v37 = vld [vmem:[%s4725_s1 + $0x644] ss:$16 sps:$4 sm:$0xff]   ;;  %v3294_v28 = vld [vmem:[%s4725_s1 + $0x3c8] ss:$16 sps:$4 sm:$0xff]  }
  0x55   :  { %1731 = vmatprep.subr.bf16.mxu0 %v3143_v36  ;;  %v3216_v36 = vld [vmem:[%s4725_s1 + $0x228] ss:$16 sps:$4 sm:$0xff]  }
  0x57   :  { %1814 = vmatpush1.bf16.msra.mxu1 %v3144_v39  ;;  %v3222_v39 = vld [vmem:[%s4725_s1 + $0x248] ss:$16 sps:$4 sm:$0xff]  }
  0x58   :  { %1732 = vmatpush1.bf16.msra.mxu0 %v3141_v38  ;;  %1815 = vmatprep.subr.bf16.mxu1 %v3152_v41  ;;  %v3219_v38 = vld [vmem:[%s4725_s1 + $0x640] ss:$16 sps:$4 sm:$0xff]  }
  0x59   :  { %1733 = vmatprep.subr.bf16.mxu0 %v3149_v40  ;;  %v3227_v40 = vld [vmem:[%s4725_s1 + $0x664] ss:$16 sps:$4 sm:$0xff]   ;;  %v3225_v41 = vld [vmem:[%s4725_s1 + $0x660] ss:$16 sps:$4 sm:$0xff]  }
  0x5b   :  { %1816 = vmatpush1.bf16.msra.mxu1 %v3150_v46  ;;  %v3231_v46 = vld [vmem:[%s4725_s1 + $0x680] ss:$16 sps:$4 sm:$0xff]  }
  0x5c   :  { %1734 = vmatpush1.bf16.msra.mxu0 %v3147_v45  ;;  %1817 = vmatprep.subr.bf16.mxu1 %v3158_v50  ;;  %v3236_v45 = vld [vmem:[%s4725_s1 + $0x28c] ss:$16 sps:$4 sm:$0xff]  }
  0x5d   :  { %1735 = vmatprep.subr.bf16.mxu0 %v3155_v48  ;;  %v3239_v48 = vld [vmem:[%s4725_s1 + $0x6a4] ss:$16 sps:$4 sm:$0xff]   ;;  %v3242_v50 = vld [vmem:[%s4725_s1 + $0x2ac] ss:$16 sps:$4 sm:$0xff]  }
  0x5f   :  { %1818 = vmatpush1.bf16.msra.mxu1 %v3156_v53  ;;  %v3240_v53 = vld [vmem:[%s4725_s1 + $0x2a8] ss:$16 sps:$4 sm:$0xff]  }
  0x60   :  { %1736 = vmatpush1.bf16.msra.mxu0 %v3153_v52  ;;  %1819 = vmatprep.subr.bf16.mxu1 %v3164_v55  ;;  %v3237_v52 = vld [vmem:[%s4725_s1 + $0x6a0] ss:$16 sps:$4 sm:$0xff]   ;;  %v3248_v55 = vld [vmem:[%s4725_s1 + $0x2cc] ss:$16 sps:$4 sm:$0xff]  }
  0x61   :  { %1737 = vmatprep.subr.bf16.mxu0 %v3161_v54  ;;  %v3245_v54 = vld [vmem:[%s4725_s1 + $0x6c4] ss:$16 sps:$4 sm:$0xff]  }
  0x63   :  { %1820 = vmatpush1.bf16.msra.mxu1 %v3162_v57  ;;  %v3246_v57 = vld [vmem:[%s4725_s1 + $0x2c8] ss:$16 sps:$4 sm:$0xff]  }
  0x64   :  { %1738 = vmatpush1.bf16.msra.mxu0 %v3159_v56  ;;  %1821 = vmatprep.subr.bf16.mxu1 %v3170_v59  ;;  %v3243_v56 = vld [vmem:[%s4725_s1 + $0x6c0] ss:$16 sps:$4 sm:$0xff]   ;;  %v3254_v59 = vld [vmem:[%s4725_s1 + $0x2ec] ss:$16 sps:$4 sm:$0xff]  }
  0x65   :  { %1739 = vmatprep.subr.bf16.mxu0 %v3167_v58  ;;  %v3251_v58 = vld [vmem:[%s4725_s1 + $0x6e4] ss:$16 sps:$4 sm:$0xff]  }
  0x67   :  { %1822 = vmatpush1.bf16.msra.mxu1 %v3168_v61  ;;  %v3252_v61 = vld [vmem:[%s4725_s1 + $0x2e8] ss:$16 sps:$4 sm:$0xff]  }
  0x68   :  { %1740 = vmatpush1.bf16.msra.mxu0 %v3165_v60  ;;  %1823 = vmatprep.subr.bf16.mxu1 %v3176_v63  ;;  %v3249_v60 = vld [vmem:[%s4725_s1 + $0x6e0] ss:$16 sps:$4 sm:$0xff]   ;;  %v3260_v63 = vld [vmem:[%s4725_s1 + $0x30c] ss:$16 sps:$4 sm:$0xff]  }
  0x69   :  { %1741 = vmatprep.subr.bf16.mxu0 %v3173_v62  ;;  %v3257_v62 = vld [vmem:[%s4725_s1 + $0x704] ss:$16 sps:$4 sm:$0xff]  }
  0x6b   :  { %1824 = vmatpush1.bf16.msra.mxu1 %v3174_v1  ;;  %v3258_v1 = vld [vmem:[%s4725_s1 + $0x308] ss:$16 sps:$4 sm:$0xff]  }
  0x6c   :  { %1742 = vmatpush1.bf16.msra.mxu0 %v3171_v0  ;;  %1825 = vmatprep.subr.bf16.mxu1 %v3182_v4  ;;  %v3255_v0 = vld [vmem:[%s4725_s1 + $0x700] ss:$16 sps:$4 sm:$0xff]   ;;  %v3266_v4 = vld [vmem:[%s4725_s1 + $0x32c] ss:$16 sps:$4 sm:$0xff]  }
  0x6d   :  { %1743 = vmatprep.subr.bf16.mxu0 %v3179_v2  ;;  %v3263_v2 = vld [vmem:[%s4725_s1 + $0x724] ss:$16 sps:$4 sm:$0xff]  }
  0x6f   :  { %1826 = vmatpush1.bf16.msra.mxu1 %v3180_v6  ;;  %v3264_v6 = vld [vmem:[%s4725_s1 + $0x328] ss:$16 sps:$4 sm:$0xff]  }
  0x70   :  { %1744 = vmatpush1.bf16.msra.mxu0 %v3177_v5  ;;  %1827 = vmatprep.subr.bf16.mxu1 %v3188_v8  ;;  %v3261_v5 = vld [vmem:[%s4725_s1 + $0x720] ss:$16 sps:$4 sm:$0xff]   ;;  %v3272_v8 = vld [vmem:[%s4725_s1 + $0x34c] ss:$16 sps:$4 sm:$0xff]  }
  0x71   :  { %1745 = vmatprep.subr.bf16.mxu0 %v3185_v7  ;;  %v3269_v7 = vld [vmem:[%s4725_s1 + $0x744] ss:$16 sps:$4 sm:$0xff]  }
  0x73   :  { %1828 = vmatpush1.bf16.msra.mxu1 %v3186_v10  ;;  %v3270_v10 = vld [vmem:[%s4725_s1 + $0x348] ss:$16 sps:$4 sm:$0xff]  }
  0x74   :  { %1746 = vmatpush1.bf16.msra.mxu0 %v3183_v9  ;;  %1829 = vmatprep.subr.bf16.mxu1 %v3194_v12  ;;  %v3267_v9 = vld [vmem:[%s4725_s1 + $0x740] ss:$16 sps:$4 sm:$0xff]   ;;  %v3278_v12 = vld [vmem:[%s4725_s1 + $0x36c] ss:$16 sps:$4 sm:$0xff]  }
  0x75   :  { %1747 = vmatprep.subr.bf16.mxu0 %v3191_v11  ;;  %v3275_v11 = vld [vmem:[%s4725_s1 + $0x764] ss:$16 sps:$4 sm:$0xff]  }
  0x77   :  { %1830 = vmatpush1.bf16.msra.mxu1 %v3192_v14  ;;  %v3276_v14 = vld [vmem:[%s4725_s1 + $0x368] ss:$16 sps:$4 sm:$0xff]  }
  0x78   :  { %1748 = vmatpush1.bf16.msra.mxu0 %v3189_v13  ;;  %1831 = vmatprep.subr.bf16.mxu1 %v3200_v17  ;;  %v3273_v13 = vld [vmem:[%s4725_s1 + $0x760] ss:$16 sps:$4 sm:$0xff]   ;;  %v3284_v17 = vld [vmem:[%s4725_s1 + $0x38c] ss:$16 sps:$4 sm:$0xff]  }
  0x79   :  { %1749 = vmatprep.subr.bf16.mxu0 %v3197_v15  ;;  %v3281_v15 = vld [vmem:[%s4725_s1 + $0x784] ss:$16 sps:$4 sm:$0xff]  }
  0x7b   :  { %1832 = vmatpush1.bf16.msra.mxu1 %v3198_v21  ;;  %v3287_v21 = vld [vmem:[%s4725_s1 + $0x7a4] ss:$16 sps:$4 sm:$0xff]  }
  0x7c   :  { %1750 = vmatpush1.bf16.msra.mxu0 %v3195_v20  ;;  %1833 = vmatprep.subr.bf16.mxu1 %v3206_v23  ;;  %v3282_v20 = vld [vmem:[%s4725_s1 + $0x388] ss:$16 sps:$4 sm:$0xff]   ;;  %v3285_v23 = vld [vmem:[%s4725_s1 + $0x7a0] ss:$16 sps:$4 sm:$0xff]  }
  0x7d   :  { %1751 = vmatprep.subr.bf16.mxu0 %v3203_v22  ;;  %v3290_v22 = vld [vmem:[%s4725_s1 + $0x3ac] ss:$16 sps:$4 sm:$0xff]  }
  0x7f   :  { %1834 = vmatpush1.bf16.msra.mxu1 %v3204_v26  ;;  %v3293_v26 = vld [vmem:[%s4725_s1 + $0x7c4] ss:$16 sps:$4 sm:$0xff]  }
  0x80   :  { %1752 = vmatpush1.bf16.msra.mxu0 %v3201_v25  ;;  %1844 = vmatprep.subr.bf16.mxu1 %v3212_v49  ;;  %v3288_v25 = vld [vmem:[%s4725_s1 + $0x3a8] ss:$16 sps:$4 sm:$0xff]   ;;  %v3291_v49 = vld [vmem:[%s4725_s1 + $0x7c0] ss:$16 sps:$4 sm:$0xff]  }
  0x81   :  { %1762 = vmatprep.subr.bf16.mxu0 %v3209_v27  ;;  %v3296_v27 = vld [vmem:[%s4725_s1 + $0x3cc] ss:$16 sps:$4 sm:$0xff]  }
  0x82   :  { %1836 = vmatmul.mubr.bf16.vlgmr.msra.gmra.mrb[4].mxu1 %v3777_v16  ;;  %v3224_v16 = vld [vmem:[%s4725_s1 + $0x24c] ss:$16 sps:$4 sm:$0xff]  }
  0x83   :  { %1754 = vmatmul.mubr.bf16.vlgmr.msra.gmra.mrb[0].mxu0 %v3998_v29  ;;  %1845 = vmatpush1.bf16.msra.mxu1 %v3210_v31  ;;  %v3302_v31 = vld [vmem:[%s4725_s1 + $0x3ec] ss:$16 sps:$4 sm:$0xff]  }
  0x84   :  { %1763 = vmatpush1.bf16.msra.mxu0 %v3207_v30  ;;  %1846 = vmatprep.subr.bf16.mxu1 %v3218_v33  ;;  %v3299_v30 = vld [vmem:[%s4725_s1 + $0x7e4] ss:$16 sps:$4 sm:$0xff]   ;;  %v3300_v33 = vld [vmem:[%s4725_s1 + $0x3e8] ss:$16 sps:$4 sm:$0xff]  }
  0x85   :  { %1764 = vmatprep.subr.bf16.mxu0 %v3215_v32  ;;  %1794 = vmatprep.mubr.bf16.mxu0 %v4012_v34  ;;  %v3297_v32 = vld [vmem:[%s4725_s1 + $0x7e0] ss:$16 sps:$4 sm:$0xff]  }
  0x86   :  { %1876 = vmatprep.mubr.bf16.mxu1 %v3738_v3  ;;  %v3230_v3 = vld [vmem:[%s4725_s1 + $0x26c] ss:$16 sps:$4 sm:$0xff]  }
  0x87   :  { %1847 = vmatpush1.bf16.msra.mxu1 %v3216_v36  ;;  %v3304_v36 = vld [vmem:[%s4725_s1 + $0x408] ss:$16 sps:$4 sm:$0xff]  }
  0x88   :  { %1765 = vmatpush1.bf16.msra.mxu0 %v3213_v35  ;;  %1848 = vmatprep.subr.bf16.mxu1 %v3224_v16  ;;  %v3306_v35 = vld [vmem:[%s4725_s1 + $0x40c] ss:$16 sps:$4 sm:$0xff]  }
  0x89   :  { %1766 = vmatprep.subr.bf16.mxu0 %v3221_v37  ;;  %v4200_v37 = vpack.c.bf16 %v3980_v24, %v3980_v24  ;;  %v3309_v16 = vld [vmem:[%s4725_s1 + $0x42c] ss:$16 sps:$4 sm:$0xff]  }
  0x8b   :  { %1849 = vmatpush1.bf16.msra.mxu1 %v3222_v39 }
  0x8c   :  { %1767 = vmatpush1.bf16.msra.mxu0 %v3219_v38  ;;  %1850 = vmatprep.subr.bf16.mxu1 %v3230_v3 }
  0x8d   :  { %1768 = vmatprep.subr.bf16.mxu0 %v3227_v40 }
  0x8f   :  { %1851 = vmatpush1.bf16.msra.mxu1 %v3228_v42 }
  0x90   :  { %1769 = vmatpush1.bf16.msra.mxu0 %v3225_v41  ;;  %1852 = vmatprep.subr.bf16.mxu1 %v3236_v45 }
  0x91   :  { %1770 = vmatprep.subr.bf16.mxu0 %v3233_v44 }
  0x93   :  { %1853 = vmatpush1.bf16.msra.mxu1 %v3234_v47 }
  0x94   :  { %1771 = vmatpush1.bf16.msra.mxu0 %v3231_v46  ;;  %1854 = vmatprep.subr.bf16.mxu1 %v3242_v50 }
  0x95   :  { %1772 = vmatprep.subr.bf16.mxu0 %v3239_v48 }
  0x97   :  { %1855 = vmatpush1.bf16.msra.mxu1 %v3240_v53 }
  0x98   :  { %1773 = vmatpush1.bf16.msra.mxu0 %v3237_v52  ;;  %1856 = vmatprep.subr.bf16.mxu1 %v3248_v55 }
  0x99   :  { %1774 = vmatprep.subr.bf16.mxu0 %v3245_v54 }
  0x9b   :  { %1857 = vmatpush1.bf16.msra.mxu1 %v3246_v57 }
  0x9c   :  { %1775 = vmatpush1.bf16.msra.mxu0 %v3243_v56  ;;  %1858 = vmatprep.subr.bf16.mxu1 %v3254_v59 }
  0x9d   :  { %1776 = vmatprep.subr.bf16.mxu0 %v3251_v58 }
  0x9f   :  { %1859 = vmatpush1.bf16.msra.mxu1 %v3252_v61 }
  0xa0   :  { %1777 = vmatpush1.bf16.msra.mxu0 %v3249_v60  ;;  %1860 = vmatprep.subr.bf16.mxu1 %v3260_v63 }
  0xa1   :  { %1778 = vmatprep.subr.bf16.mxu0 %v3257_v62 }
  0xa3   :  { %1861 = vmatpush1.bf16.msra.mxu1 %v3258_v1 }
  0xa4   :  { %1779 = vmatpush1.bf16.msra.mxu0 %v3255_v0  ;;  %1862 = vmatprep.subr.bf16.mxu1 %v3266_v4 }
  0xa5   :  { %1780 = vmatprep.subr.bf16.mxu0 %v3263_v2 }
  0xa7   :  { %1863 = vmatpush1.bf16.msra.mxu1 %v3264_v6 }
  0xa8   :  { %1781 = vmatpush1.bf16.msra.mxu0 %v3261_v5  ;;  %1864 = vmatprep.subr.bf16.mxu1 %v3272_v8 }
  0xa9   :  { %1782 = vmatprep.subr.bf16.mxu0 %v3269_v7 }
  0xab   :  { %1865 = vmatpush1.bf16.msra.mxu1 %v3270_v10 }
  0xac   :  { %1783 = vmatpush1.bf16.msra.mxu0 %v3267_v9  ;;  %1866 = vmatprep.subr.bf16.mxu1 %v3278_v12 }
  0xad   :  { %1784 = vmatprep.subr.bf16.mxu0 %v3275_v11 }
  0xaf   :  { %1867 = vmatpush1.bf16.msra.mxu1 %v3276_v14 }
  0xb0   :  { %1785 = vmatpush1.bf16.msra.mxu0 %v3273_v13  ;;  %1868 = vmatprep.subr.bf16.mxu1 %v3284_v17 }
  0xb1   :  { %1786 = vmatprep.subr.bf16.mxu0 %v3281_v15 }
  0xb3   :  { %1869 = vmatpush1.bf16.msra.mxu1 %v3282_v20 }
  0xb4   :  { %1787 = vmatpush1.bf16.msra.mxu0 %v3279_v19  ;;  %1870 = vmatprep.subr.bf16.mxu1 %v3290_v22 }
  0xb5   :  { %1788 = vmatprep.subr.bf16.mxu0 %v3287_v21 }
  0xb7   :  { %1871 = vmatpush1.bf16.msra.mxu1 %v3288_v25 }
  0xb8   :  { %1789 = vmatpush1.bf16.msra.mxu0 %v3285_v23  ;;  %1872 = vmatprep.subr.bf16.mxu1 %v3296_v27 }
  0xb9   :  { %1790 = vmatprep.subr.bf16.mxu0 %v3293_v26 }
  0xbb   :  { %1873 = vmatpush1.bf16.msra.mxu1 %v3294_v28 }
  0xbc   :  { %1791 = vmatpush1.bf16.msra.mxu0 %v3291_v49  ;;  %1874 = vmatprep.subr.bf16.mxu1 %v3302_v31 }
  0xbd   :  { %1792 = vmatprep.subr.bf16.mxu0 %v3299_v30 }
  0xbf   :  { %1875 = vmatpush1.bf16.msra.mxu1 %v3300_v33 }
  0xc0   :  { %1793 = vmatpush1.bf16.msra.mxu0 %v3297_v32  ;;  %1885 = vmatprep.subr.bf16.mxu1 %v3306_v35 }
  0xc1   :  { %12 = vsyncpa [#allocation3], 0  ;;  %v3400_v38 = vld [vmem:[%s4727_s3] ss:$8 sps:$4 sm:$0xff]   ;;  %v3402_v24 = vld [vmem:[%s4727_s3 + $0x4] ss:$8 sps:$4 sm:$0xff]  }
  0xc2   :  { %1877 = vmatmul.mubr.bf16.vlgmr.msra.gmra.mrb[4].mxu1 %v3782_v18  ;;  %v3307_v39 = vld [vmem:[%s4725_s1 + $0x428] ss:$16 sps:$4 sm:$0xff]   ;;  %v3405_v40 = vld [vmem:[%s4727_s3 + $0x14] ss:$8 sps:$4 sm:$0xff]   ;;  %2371 = vmatprep.subr.bf16.mxu0 %v3402_v24  ;;  %v3414_v50 = vld [vmem:[%s4727_s3 + $0x44] ss:$8 sps:$4 sm:$0xff]  }
  0xc3   :  { %1795 = vmatmul.mubr.bf16.vlgmr.msra.gmra.mrb[0].mxu0 %v4200_v37  ;;  %1886 = vmatpush1.bf16.msra.mxu1 %v3304_v36  ;;  %v3312_v18 = vld [vmem:[%s4725_s1 + $0x44c] ss:$16 sps:$4 sm:$0xff]   ;;  %v3403_v3 = vld [vmem:[%s4727_s3 + $0x10] ss:$8 sps:$4 sm:$0xff]   ;;  %v3406_v44 = vld [vmem:[%s4727_s3 + $0x20] ss:$8 sps:$4 sm:$0xff]  }
  0xc4   :  { %1917 = vmatprep.mubr.bf16.mxu1 %v3878_v51  ;;  %1887 = vmatprep.subr.bf16.mxu1 %v3309_v16  ;;  %v3408_v51 = vld [vmem:[%s4727_s3 + $0x24] ss:$8 sps:$4 sm:$0xff]   ;;  %v3310_v41 = vld [vmem:[%s4725_s1 + $0x448] ss:$16 sps:$4 sm:$0xff]   ;;  %v3411_v45 = vld [vmem:[%s4727_s3 + $0x34] ss:$8 sps:$4 sm:$0xff]  }
  0xc5   :  { %2372 = vmatpush1.bf16.msra.mxu0 %v3400_v38  ;;  %v3315_v42 = vld [vmem:[%s4725_s1 + $0x46c] ss:$16 sps:$4 sm:$0xff]   ;;  %v3313_v46 = vld [vmem:[%s4725_s1 + $0x468] ss:$16 sps:$4 sm:$0xff]   ;;  %vm2564_vm0 = vcmask 9216   ;;  %s3525_s13 = smov [#allocation2]  }
  0xc6   :  { %2373 = vmatprep.subr.bf16.mxu0 %v3405_v40  ;;  %v3318_v47 = vld [vmem:[%s4725_s1 + $0x48c] ss:$16 sps:$4 sm:$0xff]   ;;  %v3409_v48 = vld [vmem:[%s4727_s3 + $0x30] ss:$8 sps:$4 sm:$0xff]   ;;  %v3412_v54 = vld [vmem:[%s4727_s3 + $0x40] ss:$8 sps:$4 sm:$0xff]  }
  0xc7   :  { %1888 = vmatpush1.bf16.msra.mxu1 %v3307_v39  ;;  %v3316_v52 = vld [vmem:[%s4725_s1 + $0x488] ss:$16 sps:$4 sm:$0xff]   ;;  %v3321_v53 = vld [vmem:[%s4725_s1 + $0x4ac] ss:$16 sps:$4 sm:$0xff]   ;;  %s2584_s14 = sshll.u32 %s3525_s13, 4  ;;  %s2585_s14 = int_to_ptr.vmem [resolvable:$true] %s2584_s14 }
  0xc8   :  { %1889 = vmatprep.subr.bf16.mxu1 %v3312_v18  ;;  %v3417_v55 = vld [vmem:[%s4727_s3 + $0x54] ss:$8 sps:$4 sm:$0xff]   ;;  %v3319_v56 = vld [vmem:[%s4725_s1 + $0x4a8] ss:$16 sps:$4 sm:$0xff]   ;;  %v3420_v59 = vld [vmem:[%s4727_s3 + $0x64] ss:$8 sps:$4 sm:$0xff]   ;;  %p3505_p1 = scmp.lt.s32.totalorder %s2585_s14, %s2585_s14 }
  0xc9   :  { %2374 = vmatpush1.bf16.msra.mxu0 %v3403_v3  ;;  %v3324_v57 = vld [vmem:[%s4725_s1 + $0x4cc] ss:$16 sps:$4 sm:$0xff]   ;;  %v3415_v58 = vld [vmem:[%s4727_s3 + $0x50] ss:$8 sps:$4 sm:$0xff]   ;;  %v3418_v62 = vld [vmem:[%s4727_s3 + $0x60] ss:$8 sps:$4 sm:$0xff]  }
  0xca   :  { %2375 = vmatprep.subr.bf16.mxu0 %v3408_v51  ;;  %v3322_v60 = vld [vmem:[%s4725_s1 + $0x4c8] ss:$16 sps:$4 sm:$0xff]   ;;  %v3327_v61 = vld [vmem:[%s4725_s1 + $0x4ec] ss:$16 sps:$4 sm:$0xff]  }
  0xcb   :  { %1890 = vmatpush1.bf16.msra.mxu1 %v3310_v41  ;;  %v3423_v63 = vld [vmem:[%s4727_s3 + $0x74] ss:$8 sps:$4 sm:$0xff]   ;;  %v3325_v0 = vld [vmem:[%s4725_s1 + $0x4e8] ss:$16 sps:$4 sm:$0xff]   ;;  %v3426_v4 = vld [vmem:[%s4727_s3 + $0x84] ss:$8 sps:$4 sm:$0xff]  }
  0xcc   :  { %1891 = vmatprep.subr.bf16.mxu1 %v3315_v42  ;;  %v3330_v1 = vld [vmem:[%s4725_s1 + $0x50c] ss:$16 sps:$4 sm:$0xff]   ;;  %v3421_v2 = vld [vmem:[%s4727_s3 + $0x70] ss:$8 sps:$4 sm:$0xff]   ;;  %v3424_v7 = vld [vmem:[%s4727_s3 + $0x80] ss:$8 sps:$4 sm:$0xff]  }
  0xcd   :  { %2376 = vmatpush1.bf16.msra.mxu0 %v3406_v44  ;;  %v3328_v5 = vld [vmem:[%s4725_s1 + $0x508] ss:$16 sps:$4 sm:$0xff]   ;;  %v3333_v6 = vld [vmem:[%s4725_s1 + $0x52c] ss:$16 sps:$4 sm:$0xff]  }
  0xce   :  { %2377 = vmatprep.subr.bf16.mxu0 %v3411_v45  ;;  %v3429_v8 = vld [vmem:[%s4727_s3 + $0x94] ss:$8 sps:$4 sm:$0xff]   ;;  %v3331_v9 = vld [vmem:[%s4725_s1 + $0x528] ss:$16 sps:$4 sm:$0xff]   ;;  %v3432_v12 = vld [vmem:[%s4727_s3 + $0xa4] ss:$8 sps:$4 sm:$0xff]  }
  0xcf   :  { %1892 = vmatpush1.bf16.msra.mxu1 %v3313_v46  ;;  %v3336_v10 = vld [vmem:[%s4725_s1 + $0x54c] ss:$16 sps:$4 sm:$0xff]   ;;  %v3427_v11 = vld [vmem:[%s4727_s3 + $0x90] ss:$8 sps:$4 sm:$0xff]   ;;  %v3430_v15 = vld [vmem:[%s4727_s3 + $0xa0] ss:$8 sps:$4 sm:$0xff]  }
  0xd0   :  { %1893 = vmatprep.subr.bf16.mxu1 %v3318_v47  ;;  %v3334_v13 = vld [vmem:[%s4725_s1 + $0x548] ss:$16 sps:$4 sm:$0xff]   ;;  %v3339_v14 = vld [vmem:[%s4725_s1 + $0x56c] ss:$16 sps:$4 sm:$0xff]  }
  0xd1   :  { %2378 = vmatpush1.bf16.msra.mxu0 %v3409_v48  ;;  %v3435_v17 = vld [vmem:[%s4727_s3 + $0xb4] ss:$8 sps:$4 sm:$0xff]   ;;  %v3337_v19 = vld [vmem:[%s4725_s1 + $0x568] ss:$16 sps:$4 sm:$0xff]   ;;  %v3438_v22 = vld [vmem:[%s4727_s3 + $0xc4] ss:$8 sps:$4 sm:$0xff]  }
  0xd2   :  { %2379 = vmatprep.subr.bf16.mxu0 %v3414_v50  ;;  %v3342_v20 = vld [vmem:[%s4725_s1 + $0x58c] ss:$16 sps:$4 sm:$0xff]   ;;  %v3433_v21 = vld [vmem:[%s4727_s3 + $0xb0] ss:$8 sps:$4 sm:$0xff]   ;;  %v3436_v26 = vld [vmem:[%s4727_s3 + $0xc0] ss:$8 sps:$4 sm:$0xff]  }
  0xd3   :  { %1894 = vmatpush1.bf16.msra.mxu1 %v3316_v52  ;;  %v3340_v23 = vld [vmem:[%s4725_s1 + $0x588] ss:$16 sps:$4 sm:$0xff]   ;;  %v3345_v25 = vld [vmem:[%s4725_s1 + $0x5ac] ss:$16 sps:$4 sm:$0xff]  }
  0xd4   :  { %1895 = vmatprep.subr.bf16.mxu1 %v3321_v53  ;;  %v3441_v27 = vld [vmem:[%s4727_s3 + $0xd4] ss:$8 sps:$4 sm:$0xff]   ;;  %v3343_v49 = vld [vmem:[%s4725_s1 + $0x5a8] ss:$16 sps:$4 sm:$0xff]   ;;  %v3444_v42 = vld [vmem:[%s4727_s3 + $0xe4] ss:$8 sps:$4 sm:$0xff]  }
  0xd5   :  { %2380 = vmatpush1.bf16.msra.mxu0 %v3412_v54  ;;  %v3348_v28 = vld [vmem:[%s4725_s1 + $0x5cc] ss:$16 sps:$4 sm:$0xff]   ;;  %v3439_v30 = vld [vmem:[%s4727_s3 + $0xd0] ss:$8 sps:$4 sm:$0xff]   ;;  %v3442_v45 = vld [vmem:[%s4727_s3 + $0xe0] ss:$8 sps:$4 sm:$0xff]  }
  0xd6   :  { %2381 = vmatprep.subr.bf16.mxu0 %v3417_v55  ;;  %v3346_v31 = vld [vmem:[%s4725_s1 + $0x5c8] ss:$16 sps:$4 sm:$0xff]   ;;  %v3351_v32 = vld [vmem:[%s4725_s1 + $0x5ec] ss:$16 sps:$4 sm:$0xff]  }
  0xd7   :  { %1896 = vmatpush1.bf16.msra.mxu1 %v3319_v56  ;;  %v3349_v33 = vld [vmem:[%s4725_s1 + $0x5e8] ss:$16 sps:$4 sm:$0xff]   ;;  %v3354_v35 = vld [vmem:[%s4725_s1 + $0x60c] ss:$16 sps:$4 sm:$0xff]  }
  0xd8   :  { %1897 = vmatprep.subr.bf16.mxu1 %v3324_v57  ;;  %v3352_v36 = vld [vmem:[%s4725_s1 + $0x608] ss:$16 sps:$4 sm:$0xff]   ;;  %v3357_v16 = vld [vmem:[%s4725_s1 + $0x62c] ss:$16 sps:$4 sm:$0xff]  }
  0xd9   :  { %2382 = vmatpush1.bf16.msra.mxu0 %v3415_v58  ;;  %v3355_v38 = vld [vmem:[%s4725_s1 + $0x628] ss:$16 sps:$4 sm:$0xff]   ;;  %v3360_v24 = vld [vmem:[%s4725_s1 + $0x64c] ss:$16 sps:$4 sm:$0xff]  }
  0xda   :  { %2383 = vmatprep.subr.bf16.mxu0 %v3420_v59  ;;  %v3358_v39 = vld [vmem:[%s4725_s1 + $0x648] ss:$16 sps:$4 sm:$0xff]   ;;  %v3366_v40 = vld [vmem:[%s4725_s1 + $0x68c] ss:$16 sps:$4 sm:$0xff]  }
  0xdb   :  { %1898 = vmatpush1.bf16.msra.mxu1 %v3322_v60  ;;  %v3364_v18 = vld [vmem:[%s4725_s1 + $0x688] ss:$16 sps:$4 sm:$0xff]   ;;  %v3369_v3 = vld [vmem:[%s4725_s1 + $0x6ac] ss:$16 sps:$4 sm:$0xff]  }
  0xdc   :  { %1899 = vmatprep.subr.bf16.mxu1 %v3327_v61  ;;  %v3367_v51 = vld [vmem:[%s4725_s1 + $0x6a8] ss:$16 sps:$4 sm:$0xff]   ;;  %v3372_v41 = vld [vmem:[%s4725_s1 + $0x6cc] ss:$16 sps:$4 sm:$0xff]  }
  0xdd   :  { %2384 = vmatpush1.bf16.msra.mxu0 %v3418_v62  ;;  %v3370_v48 = vld [vmem:[%s4725_s1 + $0x6c8] ss:$16 sps:$4 sm:$0xff]   ;;  %v3375_v52 = vld [vmem:[%s4725_s1 + $0x6ec] ss:$16 sps:$4 sm:$0xff]  }
  0xde   :  { %2385 = vmatprep.subr.bf16.mxu0 %v3423_v63  ;;  %v3447_v53 = vld [vmem:[%s4727_s3 + $0xf4] ss:$8 sps:$4 sm:$0xff]   ;;  %v3445_v54 = vld [vmem:[%s4727_s3 + $0xf0] ss:$8 sps:$4 sm:$0xff]   ;;  %v3450_v57 = vld [vmem:[%s4727_s3 + $0x104] ss:$8 sps:$4 sm:$0xff]  }
  0xdf   :  { %1900 = vmatpush1.bf16.msra.mxu1 %v3325_v0  ;;  %v3373_v55 = vld [vmem:[%s4725_s1 + $0x6e8] ss:$16 sps:$4 sm:$0xff]   ;;  %v3378_v56 = vld [vmem:[%s4725_s1 + $0x70c] ss:$16 sps:$4 sm:$0xff]  }
  0xe0   :  { %1901 = vmatprep.subr.bf16.mxu1 %v3330_v1  ;;  %v3376_v58 = vld [vmem:[%s4725_s1 + $0x708] ss:$16 sps:$4 sm:$0xff]   ;;  %v3381_v59 = vld [vmem:[%s4725_s1 + $0x72c] ss:$16 sps:$4 sm:$0xff]  }
  0xe1   :  { %2386 = vmatpush1.bf16.msra.mxu0 %v3421_v2  ;;  %v3379_v60 = vld [vmem:[%s4725_s1 + $0x728] ss:$16 sps:$4 sm:$0xff]   ;;  %v3384_v61 = vld [vmem:[%s4725_s1 + $0x74c] ss:$16 sps:$4 sm:$0xff]  }
  0xe2   :  { %2387 = vmatprep.subr.bf16.mxu0 %v3426_v4  ;;  %v3382_v62 = vld [vmem:[%s4725_s1 + $0x748] ss:$16 sps:$4 sm:$0xff]   ;;  %v3387_v63 = vld [vmem:[%s4725_s1 + $0x76c] ss:$16 sps:$4 sm:$0xff]  }
  0xe3   :  { %1902 = vmatpush1.bf16.msra.mxu1 %v3328_v5  ;;  %v3385_v0 = vld [vmem:[%s4725_s1 + $0x768] ss:$16 sps:$4 sm:$0xff]   ;;  %v3390_v1 = vld [vmem:[%s4725_s1 + $0x78c] ss:$16 sps:$4 sm:$0xff]  }
  0xe4   :  { %1903 = vmatprep.subr.bf16.mxu1 %v3333_v6  ;;  %v3388_v2 = vld [vmem:[%s4725_s1 + $0x788] ss:$16 sps:$4 sm:$0xff]   ;;  %v3393_v4 = vld [vmem:[%s4725_s1 + $0x7ac] ss:$16 sps:$4 sm:$0xff]  }
  0xe5   :  { %2388 = vmatpush1.bf16.msra.mxu0 %v3424_v7  ;;  %v3391_v5 = vld [vmem:[%s4725_s1 + $0x7a8] ss:$16 sps:$4 sm:$0xff]   ;;  %v3396_v6 = vld [vmem:[%s4725_s1 + $0x7cc] ss:$16 sps:$4 sm:$0xff]  }
  0xe6   :  { %2389 = vmatprep.subr.bf16.mxu0 %v3429_v8  ;;  %v3394_v7 = vld [vmem:[%s4725_s1 + $0x7c8] ss:$16 sps:$4 sm:$0xff]   ;;  %v3399_v8 = vld [vmem:[%s4725_s1 + $0x7ec] ss:$16 sps:$4 sm:$0xff]  }
  0xe7   :  { %1904 = vmatpush1.bf16.msra.mxu1 %v3331_v9  ;;  %v3397_v9 = vld [vmem:[%s4725_s1 + $0x7e8] ss:$16 sps:$4 sm:$0xff]  }
  0xe8   :  { %1905 = vmatprep.subr.bf16.mxu1 %v3336_v10  ;;  %v341_v10 = vsub.s32 0, %v3683_v43 }
  0xe9   :  { %2390 = vmatpush1.bf16.msra.mxu0 %v3427_v11  ;;  %v4497_v11 = vld [vmem:[%s4726_s2] sm:$0xf] }
  0xea   :  { %2391 = vmatprep.subr.bf16.mxu0 %v3432_v12  ;;  %v345_v12 = vsub.s32 1, %v3683_v43 }
  0xeb   :  { %1906 = vmatpush1.bf16.msra.mxu1 %v3334_v13  ;;  %v342_v13 = vrot.slane %v4497_v11, %v341_v10 }
  0xec   :  { %1907 = vmatprep.subr.bf16.mxu1 %v3339_v14  ;;  %v346_v14 = vrot.slane %v4497_v11, %v345_v12 }
  0xed   :  { %2392 = vmatpush1.bf16.msra.mxu0 %v3430_v15 }
  0xee   :  { %2393 = vmatprep.subr.bf16.mxu0 %v3435_v17 }
  0xef   :  { %1908 = vmatpush1.bf16.msra.mxu1 %v3337_v19 }
  0xf0   :  { %1909 = vmatprep.subr.bf16.mxu1 %v3342_v20 }
  0xf1   :  { %2394 = vmatpush1.bf16.msra.mxu0 %v3433_v21 }
  0xf2   :  { %2395 = vmatprep.subr.bf16.mxu0 %v3438_v22 }
  0xf3   :  { %1910 = vmatpush1.bf16.msra.mxu1 %v3340_v23 }
  0xf4   :  { %1911 = vmatprep.subr.bf16.mxu1 %v3345_v25 }
  0xf5   :  { %2396 = vmatpush1.bf16.msra.mxu0 %v3436_v26 }
  0xf6   :  { %2397 = vmatprep.subr.bf16.mxu0 %v3441_v27 }
  0xf7   :  { %1912 = vmatpush1.bf16.msra.mxu1 %v3343_v49  ;;  %v3448_v49 = vld [vmem:[%s4727_s3 + $0x100] ss:$8 sps:$4 sm:$0xff]  }
  0xf8   :  { %1913 = vmatprep.subr.bf16.mxu1 %v3348_v28 }
  0xf9   :  { %2398 = vmatpush1.bf16.msra.mxu0 %v3439_v30  ;;  %v3453_v30 = vld [vmem:[%s4727_s3 + $0x114] ss:$8 sps:$4 sm:$0xff]  }
  0xfa   :  { %2399 = vmatprep.subr.bf16.mxu0 %v3444_v42  ;;  %v3454_v42 = vld [vmem:[%s4727_s3 + $0x120] ss:$8 sps:$4 sm:$0xff]  }
  0xfb   :  { %1914 = vmatpush1.bf16.msra.mxu1 %v3346_v31  ;;  %v3451_v31 = vld [vmem:[%s4727_s3 + $0x110] ss:$8 sps:$4 sm:$0xff]  }
  0xfc   :  { %1915 = vmatprep.subr.bf16.mxu1 %v3351_v32  ;;  %v3456_v32 = vld [vmem:[%s4727_s3 + $0x124] ss:$8 sps:$4 sm:$0xff]  }
  0xfd   :  { %2400 = vmatpush1.bf16.msra.mxu0 %v3442_v45  ;;  %v2459_v45 = vld [vmem:[%s4729_s5 + $0x20] sm:$0xff] }
  0xfe   :  { %2401 = vmatprep.subr.bf16.mxu0 %v3447_v53  ;;  %v3457_v53 = vld [vmem:[%s4727_s3 + $0x130] ss:$8 sps:$4 sm:$0xff]  }
  0xff   :  { %1916 = vmatpush1.bf16.msra.mxu1 %v3349_v33  ;;  %v2471_v33 = vld [vmem:[%s4729_s5 + $0x80] sm:$0xff] }
 0x100   :  { %1926 = vmatprep.subr.bf16.mxu1 %v3354_v35  ;;  %v2472_v35 = vld [vmem:[%s4729_s5 + $0x88] sm:$0xff] }
 0x101   :  { %2402 = vmatpush1.bf16.msra.mxu0 %v3445_v54 }
 0x102   :  { %1918 = vmatmul.mubr.bf16.vlgmr.msra.gmra.mrb[4].mxu1 %v3998_v29  ;;  %v3363_v29 = vld [vmem:[%s4725_s1 + $0x66c] ss:$16 sps:$4 sm:$0xff]   ;;  %2412 = vmatprep.subr.bf16.mxu0 %v3450_v57 }
 0x103   :  { %1927 = vmatpush1.bf16.msra.mxu1 %v3352_v36  ;;  %1958 = vmatprep.mubr.bf16.mxu1 %v4012_v34  ;;  %v3361_v34 = vld [vmem:[%s4725_s1 + $0x668] ss:$16 sps:$4 sm:$0xff]   ;;  %v2455_v36 = vld [vmem:[%s4729_s5] sm:$0xff] }
 0x104   :  { %1928 = vmatprep.subr.bf16.mxu1 %v3357_v16  ;;  %v2948_v16 = vpack.c.bf16 %v2472_v35, %v2471_v33  ;;  %v3462_v57 = vld [vmem:[%s4727_s3 + $0x144] ss:$8 sps:$4 sm:$0xff]   ;;  %v3489_v33 = vld [vmem:[%s4727_s3 + $0x1d4] ss:$8 sps:$4 sm:$0xff]   ;;  %v3487_v35 = vld [vmem:[%s4727_s3 + $0x1d0] ss:$8 sps:$4 sm:$0xff]  }
 0x107   :  { %1929 = vmatpush1.bf16.msra.mxu1 %v3355_v38  ;;  %v2456_v38 = vld [vmem:[%s4729_s5 + $0x8] sm:$0xff] }
 0x108   :  { %1930 = vmatprep.subr.bf16.mxu1 %v3360_v24  ;;  %v2473_v24 = vld [vmem:[%s4729_s5 + $0x90] sm:$0xff] }
 0x10b   :  { %1931 = vmatpush1.bf16.msra.mxu1 %v3358_v39  ;;  %v2474_v39 = vld [vmem:[%s4729_s5 + $0x98] sm:$0xff] }
 0x10c   :  { %1932 = vmatprep.subr.bf16.mxu1 %v3363_v29  ;;  %v2950_v29 = vpack.c.bf16 %v2456_v38, %v2455_v36  ;;  %v3492_v36 = vld [vmem:[%s4727_s3 + $0x1e4] ss:$8 sps:$4 sm:$0xff]   ;;  %v3495_v38 = vld [vmem:[%s4727_s3 + $0x1f4] ss:$8 sps:$4 sm:$0xff]  }
 0x10f   :  { %1933 = vmatpush1.bf16.msra.mxu1 %v3361_v34  ;;  %v2952_v34 = vpack.c.bf16 %v2474_v39, %v2473_v24  ;;  %v3493_v24 = vld [vmem:[%s4727_s3 + $0x1f0] ss:$8 sps:$4 sm:$0xff]   ;;  %v349_v39 = vsub.s32 2, %v3683_v43 }
 0x110   :  { %1934 = vmatprep.subr.bf16.mxu1 %v3366_v40  ;;  %v2457_v40 = vld [vmem:[%s4729_s5 + $0x10] sm:$0xff] }
 0x113   :  { %1935 = vmatpush1.bf16.msra.mxu1 %v3364_v18  ;;  %v2458_v18 = vld [vmem:[%s4729_s5 + $0x18] sm:$0xff] }
 0x114   :  { %1936 = vmatprep.subr.bf16.mxu1 %v3369_v3  ;;  %v2475_v3 = vld [vmem:[%s4729_s5 + $0xa0] sm:$0xff] }
 0x115   :  { %v1673_v44 = vpop.f32.mrb[0].mxu1 }
 0x116   :  { %v1675_v46 = vpop.f32.mrb[1].mxu1  ;;  %v1674_v15 = vadd.f32 %v1673_v44, %v342_v13  ;;  %v3468_v13 = vld [vmem:[%s4727_s3 + $0x164] ss:$8 sps:$4 sm:$0xff]  }
 0x117   :  { %v1677_v47 = vpop.f32.mrb[2].mxu1  ;;  %1937 = vmatpush1.bf16.msra.mxu1 %v3367_v51  ;;  %v1676_v17 = vadd.f32 %v1675_v46, %v346_v14  ;;  %v2476_v51 = vld [vmem:[%s4729_s5 + $0xa8] sm:$0xff]  ;;  %v2483_v14 = vld [vmem:[%s4729_s5 + $0xe0] sm:$0xff] }
 0x118   :  { %v1678_v50 = vpop.f32.mrb[3].mxu1  ;;  %1938 = vmatprep.subr.bf16.mxu1 %v3372_v41  ;;  %v2954_v41 = vpack.c.bf16 %v2458_v18, %v2457_v40  ;;  %v2956_v44 = vpack.c.bf16 %v2476_v51, %v2475_v3  ;;  %v2460_v46 = vld [vmem:[%s4729_s5 + $0x28] sm:$0xff]  ;;  %v3459_v47 = vld [vmem:[%s4727_s3 + $0x134] ss:$8 sps:$4 sm:$0xff]  }
 0x119   :  { %v2478_v50 = vld [vmem:[%s4729_s5 + $0xb8] sm:$0xff] }
 0x11b   :  { %1939 = vmatpush1.bf16.msra.mxu1 %v3370_v48  ;;  %v2477_v48 = vld [vmem:[%s4729_s5 + $0xb0] sm:$0xff] }
 0x11c   :  { %1940 = vmatprep.subr.bf16.mxu1 %v3375_v52  ;;  %v2958_v52 = vpack.c.bf16 %v2460_v46, %v2459_v45  ;;  %v2960_v54 = vpack.c.bf16 %v2478_v50, %v2477_v48  ;;  %v2467_v50 = vld [vmem:[%s4729_s5 + $0x60] sm:$0xff] }
 0x11f   :  { %1941 = vmatpush1.bf16.msra.mxu1 %v3373_v55  ;;  %v2461_v55 = vld [vmem:[%s4729_s5 + $0x30] sm:$0xff] }
 0x120   :  { %1942 = vmatprep.subr.bf16.mxu1 %v3378_v56  ;;  %v2462_v56 = vld [vmem:[%s4729_s5 + $0x38] sm:$0xff] }
 0x123   :  { %1943 = vmatpush1.bf16.msra.mxu1 %v3376_v58  ;;  %v2479_v58 = vld [vmem:[%s4729_s5 + $0xc0] sm:$0xff] }
 0x124   :  { %1944 = vmatprep.subr.bf16.mxu1 %v3381_v59  ;;  %v2480_v59 = vld [vmem:[%s4729_s5 + $0xc8] sm:$0xff] }
 0x127   :  { %1945 = vmatpush1.bf16.msra.mxu1 %v3379_v60  ;;  %v2962_v60 = vpack.c.bf16 %v2462_v56, %v2461_v55  ;;  %v2469_v56 = vld [vmem:[%s4729_s5 + $0x70] sm:$0xff] }
 0x128   :  { %1946 = vmatprep.subr.bf16.mxu1 %v3384_v61  ;;  %v3460_v61 = vld [vmem:[%s4727_s3 + $0x140] ss:$8 sps:$4 sm:$0xff]  }
 0x12b   :  { %1947 = vmatpush1.bf16.msra.mxu1 %v3382_v62  ;;  %v2964_v62 = vpack.c.bf16 %v2480_v59, %v2479_v58  ;;  %v2039_v59 = vld [vmem:[%s4728_s4] sm:$0x3] }
 0x12c   :  { %1948 = vmatprep.subr.bf16.mxu1 %v3387_v63  ;;  %v2463_v63 = vld [vmem:[%s4729_s5 + $0x40] sm:$0xff] }
 0x12f   :  { %1949 = vmatpush1.bf16.msra.mxu1 %v3385_v0  ;;  %v2464_v0 = vld [vmem:[%s4729_s5 + $0x48] sm:$0xff] }
 0x130   :  { %1950 = vmatprep.subr.bf16.mxu1 %v3390_v1  ;;  %v3465_v1 = vld [vmem:[%s4727_s3 + $0x154] ss:$8 sps:$4 sm:$0xff]  }
 0x133   :  { %1951 = vmatpush1.bf16.msra.mxu1 %v3388_v2  ;;  %v2481_v2 = vld [vmem:[%s4729_s5 + $0xd0] sm:$0xff] }
 0x134   :  { %1952 = vmatprep.subr.bf16.mxu1 %v3393_v4  ;;  %v2482_v4 = vld [vmem:[%s4729_s5 + $0xd8] sm:$0xff] }
 0x137   :  { %1953 = vmatpush1.bf16.msra.mxu1 %v3391_v5  ;;  %v2966_v5 = vpack.c.bf16 %v2464_v0, %v2463_v63 }
 0x138   :  { %1954 = vmatprep.subr.bf16.mxu1 %v3396_v6  ;;  %v3463_v6 = vld [vmem:[%s4727_s3 + $0x150] ss:$8 sps:$4 sm:$0xff]  }
 0x13b   :  { %1955 = vmatpush1.bf16.msra.mxu1 %v3394_v7  ;;  %v2968_v7 = vpack.c.bf16 %v2482_v4, %v2481_v2 }
 0x13c   :  { %1956 = vmatprep.subr.bf16.mxu1 %v3399_v8  ;;  %v2465_v8 = vld [vmem:[%s4729_s5 + $0x50] sm:$0xff] }
 0x13f   :  { %1957 = vmatpush1.bf16.msra.mxu1 %v3397_v9  ;;  %v2466_v9 = vld [vmem:[%s4729_s5 + $0x58] sm:$0xff] }
 0x140   :  { %2949 = vmatprep.subr.bf16.mxu1 %v2948_v16  ;;  %v3490_v16 = vld [vmem:[%s4727_s3 + $0x1e0] ss:$8 sps:$4 sm:$0xff]  }
 0x142   :  { %1959 = vmatmul.mubr.bf16.vlgmr.msra.gmra.mrb[4].mxu1 %v4200_v37 }
 0x143   :  { %2951 = vmatpush3.bf16.msra.mxu1 %v2950_v29  ;;  %v353_v29 = vsub.s32 3, %v3683_v43 }
 0x144   :  { %2953 = vmatprep.subr.bf16.mxu1 %v2952_v34  ;;  %v350_v34 = vrot.slane %v4497_v11, %v349_v39 }
 0x145   :  { %v354_v40 = vrot.slane %v4497_v11, %v353_v29  ;;  %v2468_v11 = vld [vmem:[%s4729_s5 + $0x68] sm:$0xff] }
 0x147   :  { %2955 = vmatpush3.bf16.msra.mxu1 %v2954_v41 }
 0x148   :  { %2957 = vmatprep.subr.bf16.mxu1 %v2956_v44 }
 0x14b   :  { %2959 = vmatpush3.bf16.msra.mxu1 %v2958_v52  ;;  %v2974_v52 = vpack.c.bf16 %v2468_v11, %v2467_v50 }
 0x14c   :  { %2961 = vmatprep.subr.bf16.mxu1 %v2960_v54  ;;  %v2486_v54 = vld [vmem:[%s4729_s5 + $0xf8] sm:$0xff] }
 0x14f   :  { %2963 = vmatpush3.bf16.msra.mxu1 %v2962_v60  ;;  %v2044_v60 = vrot.slane %v2039_v59, %v341_v10 }
 0x150   :  { %2965 = vmatprep.subr.bf16.mxu1 %v2964_v62 }
 0x153   :  { %2967 = vmatpush3.bf16.msra.mxu1 %v2966_v5 }
 0x154   :  { %2969 = vmatprep.subr.bf16.mxu1 %v2968_v7 }
 0x196   :  { %v1796_v37 = vpop.f32.mrb[0].mxu0 }
 0x197   :  { %v2981_v19 = vadd.f32 %v1796_v37, %v1674_v15  ;;  %v1798_v20 = vpop.f32.mrb[1].mxu0  ;;  %v2484_v15 = vld [vmem:[%s4729_s5 + $0xe8] sm:$0xff] }
 0x198   :  { %v2983_v21 = vadd.f32 %v1798_v20, %v1676_v17  ;;  %v1800_v22 = vpop.f32.mrb[2].mxu0  ;;  %v2970_v17 = vpack.c.bf16 %v2466_v9, %v2465_v8  ;;  %v3466_v37 = vld [vmem:[%s4727_s3 + $0x160] ss:$8 sps:$4 sm:$0xff]   ;;  %v3471_v20 = vld [vmem:[%s4727_s3 + $0x174] ss:$8 sps:$4 sm:$0xff]  }
 0x199   :  { %v1967_v23 = vmax.f32 %v2981_v19, 0.0  ;;  %v1801_v25 = vpop.f32.mrb[3].mxu0  ;;  %v2972_v19 = vpack.c.bf16 %v2484_v15, %v2483_v14  ;;  %v3474_v22 = vld [vmem:[%s4727_s3 + $0x184] ss:$8 sps:$4 sm:$0xff]   ;;  %v2912_v9 = vld [vmem:[%s4730_s6] ss:$0 sm:$0xff] }
 0x19a   :  { %v1968_v26 = vmax.f32 %v2983_v21, 0.0  ;;  %2971 = vmatpush3.bf16.msra.mxu1 %v2970_v17  ;;  %v3469_v21 = vld [vmem:[%s4727_s3 + $0x170] ss:$8 sps:$4 sm:$0xff]   ;;  %v3477_v25 = vld [vmem:[%s4727_s3 + $0x194] ss:$8 sps:$4 sm:$0xff]   ;;  %s3500_s6 = scalar_lea.vmem %s2585_s14, 32 }
 0x19b   :  { %v1971_v28 = vpack.c.bf16 %v1967_v23, %v1967_v23  ;;  %2973 = vmatprep.subr.bf16.mxu1 %v2972_v19  ;;  %v3472_v23 = vld [vmem:[%s4727_s3 + $0x180] ss:$8 sps:$4 sm:$0xff]   ;;  %p3501_p0 = scmp.ne.s32.totalorder %s2585_s14, %s3500_s6  ;;  %p3506_p2 = scmp.lt.s32.totalorder %s3500_s6, %s3500_s6 }
 0x19c   :  { %v1972_v27 = vpack.c.bf16 %v1968_v26, %v1968_v26  ;;  %v3475_v26 = vld [vmem:[%s4727_s3 + $0x190] ss:$8 sps:$4 sm:$0xff]  }
 0x19d   :  { %p3507_p3 = por %p3506_p2, %p3505_p1 }
 0x19e   :  { %2403 = vmatprep.mubr.bf16.mxu0 %v1972_v27  ;;  %v3480_v27 = vld [vmem:[%s4727_s3 + $0x1a4] ss:$8 sps:$4 sm:$0xff]   ;;  %2975 = vmatpush3.bf16.msra.mxu1 %v2974_v52 }
 0x19f   :  { %2404 = vmatmul.mubr.bf16.vlgmr.msra.gmra.mrb[4].mxu0 %v1971_v28  ;;  %v3483_v28 = vld [vmem:[%s4727_s3 + $0x1b4] ss:$8 sps:$4 sm:$0xff]   ;;  %p3508_p4 = pnand %p3507_p3, %p3501_p0 }
 0x1a0   :  { %2413 = vmatpush1.bf16.msra.mxu0 %v3448_v49  ;;  %v3478_v49 = vld [vmem:[%s4727_s3 + $0x1a0] ss:$8 sps:$4 sm:$0xff]  }
 0x1a1   :  { %2414 = vmatprep.subr.bf16.mxu0 %v3453_v30  ;;  %v3481_v30 = vld [vmem:[%s4727_s3 + $0x1b0] ss:$8 sps:$4 sm:$0xff]  }
 0x1a4   :  { %2415 = vmatpush1.bf16.msra.mxu0 %v3451_v31  ;;  %v3486_v31 = vld [vmem:[%s4727_s3 + $0x1c4] ss:$8 sps:$4 sm:$0xff]  }
 0x1a5   :  { %2416 = vmatprep.subr.bf16.mxu0 %v3456_v32  ;;  %v3484_v32 = vld [vmem:[%s4727_s3 + $0x1c0] ss:$8 sps:$4 sm:$0xff]  }
 0x1a8   :  { %2417 = vmatpush1.bf16.msra.mxu0 %v3454_v42 }
 0x1a9   :  { %2418 = vmatprep.subr.bf16.mxu0 %v3459_v47 }
 0x1ac   :  { %2419 = vmatpush1.bf16.msra.mxu0 %v3457_v53  ;;  %v2485_v53 = vld [vmem:[%s4729_s5 + $0xf0] sm:$0xff] }
 0x1ad   :  { %2420 = vmatprep.subr.bf16.mxu0 %v3462_v57  ;;  %v2976_v55 = vpack.c.bf16 %v2486_v54, %v2485_v53  ;;  %v2470_v57 = vld [vmem:[%s4729_s5 + $0x78] sm:$0xff] }
 0x1ae   :  { %v2978_v58 = vpack.c.bf16 %v2470_v57, %v2469_v56 }
 0x1af   :  { %2977 = vmatprep.subr.bf16.mxu1 %v2976_v55 }
 0x1b0   :  { %2421 = vmatpush1.bf16.msra.mxu0 %v3460_v61  ;;  %2979 = vmatpush3.bf16.msra.mxu1 %v2978_v58  ;;  %v2048_v61 = vrot.slane %v2039_v59, %v345_v12 }
 0x1b1   :  { %2422 = vmatprep.subr.bf16.mxu0 %v3465_v1 }
 0x1b4   :  { %2423 = vmatpush1.bf16.msra.mxu0 %v3463_v6 }
 0x1b5   :  { %2424 = vmatprep.subr.bf16.mxu0 %v3468_v13 }
 0x1b8   :  { %2425 = vmatpush1.bf16.msra.mxu0 %v3466_v37 }
 0x1b9   :  { %2426 = vmatprep.subr.bf16.mxu0 %v3471_v20 }
 0x1bc   :  { %2427 = vmatpush1.bf16.msra.mxu0 %v3469_v21 }
 0x1bd   :  { %2428 = vmatprep.subr.bf16.mxu0 %v3474_v22 }
 0x1c0   :  { %2429 = vmatpush1.bf16.msra.mxu0 %v3472_v23 }
 0x1c1   :  { %2430 = vmatprep.subr.bf16.mxu0 %v3477_v25 }
 0x1c4   :  { %2431 = vmatpush1.bf16.msra.mxu0 %v3475_v26 }
 0x1c5   :  { %2432 = vmatprep.subr.bf16.mxu0 %v3480_v27 }
 0x1c8   :  { %2433 = vmatpush1.bf16.msra.mxu0 %v3478_v49 }
 0x1c9   :  { %2434 = vmatprep.subr.bf16.mxu0 %v3483_v28 }
 0x1cc   :  { %2435 = vmatpush1.bf16.msra.mxu0 %v3481_v30 }
 0x1cd   :  { %2436 = vmatprep.subr.bf16.mxu0 %v3486_v31 }
 0x1d0   :  { %2437 = vmatpush1.bf16.msra.mxu0 %v3484_v32 }
 0x1d1   :  { %2438 = vmatprep.subr.bf16.mxu0 %v3489_v33 }
 0x1d4   :  { %2439 = vmatpush1.bf16.msra.mxu0 %v3487_v35 }
 0x1d5   :  { %2440 = vmatprep.subr.bf16.mxu0 %v3492_v36 }
 0x1d8   :  { %2441 = vmatpush1.bf16.msra.mxu0 %v3490_v16 }
 0x1d9   :  { %2442 = vmatprep.subr.bf16.mxu0 %v3495_v38 }
 0x1dc   :  { %2443 = vmatpush1.bf16.msra.mxu0 %v3493_v24 }
 0x215   :  { %v1960_v18 = vpop.f32.mrb[4].mxu1 }
 0x216   :  { %v2984_v3 = vadd.f32 %v1960_v18, %v350_v34  ;;  %v1962_v51 = vpop.f32.mrb[5].mxu1 }
 0x217   :  { %v2985_v41 = vadd.f32 %v1962_v51, %v354_v40  ;;  %v1964_v42 = vpop.f32.mrb[6].mxu1 }
 0x218   :  { %v1969_v44 = vmax.f32 %v2984_v3, 0.0  ;;  %v1965_v45 = vpop.f32.mrb[7].mxu1 }
 0x219   :  { %v1970_v46 = vmax.f32 %v2985_v41, 0.0 }
 0x21a   :  { %v1973_v48 = vpack.c.bf16 %v1969_v44, %v1969_v44 }
 0x21b   :  { %v1974_v47 = vpack.c.bf16 %v1970_v46, %v1970_v46 }
 0x21d   :  { %2444 = vmatprep.mubr.bf16.mxu0 %v1974_v47 }
 0x21e   :  { %2445 = vmatmul.mubr.bf16.vlgmr.msra.gmra.mrb[4].mxu0 %v1973_v48 }
 0x2f1   :  { %v2446_v62 = vpop.f32.mrb[4].mxu0 }
 0x2f2   :  { %v2986_v63 = vadd.f32 %v2446_v62, %v2044_v60  ;;  %v2448_v0 = vpop.f32.mrb[5].mxu0 }
 0x2f3   :  { %v2987_v1 = vadd.f32 %v2448_v0, %v2048_v61  ;;  %v2450_v2 = vpop.f32.mrb[6].mxu0 }
 0x2f4   :  { %v2451_v4 = vpop.f32.mrb[7].mxu0  ;;  %v2453_v6 = vmax.f32 %v2986_v63, 0.0 }
 0x2f5   :  { %v2454_v5 = vmax.f32 %v2987_v1, 0.0 }
 0x2f7   :  { %2558 = vmatprep.mubr.f32.mxu1 %v2454_v5 }
 0x2f8   :  { %2559 = vmatmul.mubr.f32.vlgmr.msra.gmra.mrb[8].mxu1 %v2453_v6 }
 0x3cb   :  { %v2945_v7 = vpop.f32.mrb[8].mxu1 }
 0x3cc   :  { %v2946_v8 = vpop.f32.mrb[9].mxu1 }
 0x3cd   :  { %v2947_v10 = vadd.f32 %v2946_v8, %v2945_v7 }
 0x3cf   :  { %v2561_v43 = vadd.f32 %v2947_v10, %v2912_v9 }
 0x3d1   :  { %v2565_v12 = vsel %vm2564_vm0, %v2561_v43, -inf }
 0x3d2   :  { %2566 = vmax.xlane.f32.xlu0 %v2565_v12 }
 0x45f   :  { %v2567_v13 = vpop.xlane.xlu0 %2566 }
 0x460   :  { %v2568_v14 = vsub.f32 %v2561_v43, %v2567_v13 }
 0x462   :  { %v2569_v15 = vmul.f32 1.442695, %v2568_v14 }
 0x464   :  { %3496 = vpow2.f32 %v2569_v15 }
 0x46e   :  { %v3497_v17 = vpop.eup %3496 }
 0x46f   :  { %v2571_v37 = vsel %vm2564_vm0, %v3497_v17, 0.0 }
 0x470   :  { %2572 = vadd.xlane.f32.xlu0 %v2571_v37 }
 0x4fd   :  { %v2573_v19 = vpop.xlane.xlu0 %2572 }
 0x4fe   :  { %3498 = vlog2.f32 %v2573_v19 }
 0x508   :  { %v3499_v20 = vpop.eup %3498 }
 0x509   :  { %v2575_v21 = vmul.f32 0.6931472, %v3499_v20 }
 0x50b   :  { %v2576_v22 = vsub.f32 %v2568_v14, %v2575_v21 }
 0x50d   :  { %2577 = vst.msk [vmem:[#allocation2] sm:$0x3] %vm2564_vm0, %v2576_v22 }
 0x50e   :  { %3511 = shalt.err (!%p3508_p4)
}
 0x50f   :  { %s3512_s2 = scalar_lea.hbm %s4731_s7, 32 }
 0x510   :  { %p3513_p5 = scmp.ne.s32.totalorder %s4731_s7, %s3512_s2  ;;  %p3516_p6 = scmp.lt.u32.totalorder %s3512_s2, %s4731_s7 }
 0x512   :  { %p3518_p7 = pnand %p3516_p6, %p3513_p5 }
 0x514   :  { %3521 = shalt.err (!%p3518_p7)
}
 0x515   :  { %2587 = dma.vmem_to_hbm [thread:$0]  %s2585_s14, 32, %s4731_s7, [#allocation3]  }
 0x516   :  { %3522 = dma.done.wait [#allocation3], 32  }
 0x517   :  { %3523 = vsyncadd [#allocation3], 4294967264 }
 0x518   :  { %2591 = vsyncpa [#allocation3], 1 }

</bundles_post_ra>
